<compile_context>
chip_gen: v5e
topology: v5e:2x2
jax: 0.10.0
libtpu: 0.0.40
codegen_flags: <defaults>
</compile_context>

<pallas_src>
import functools

import jax
import jax.numpy as jnp
from jax import lax
from jax.experimental import pallas as pl
from jax.experimental.pallas import tpu as pltpu


def _layernorm(x, gamma, beta, eps=1e-5):
    # single-pass: one cross-lane reduction pair instead of two dependent ones
    mu = jnp.mean(x, axis=-1, keepdims=True)
    msq = jnp.mean(x * x, axis=-1, keepdims=True)
    var = msq - mu * mu
    return (x - mu) * lax.rsqrt(var + eps) * gamma + beta


def decoder_kernel(
    x1_ref, x2_ref,
    swqkv_ref,   # (D, 3*H*Dh)  bf16, self-attn fused Q|K|V (Q pre-scaled)
    sfw_ref,     # (H*Dh, Dh)   bf16, self-attn output projection
    cwq_ref,     # (D, H*Dh)    bf16, cross-attn Q (pre-scaled)
    cwkv_ref,    # (D, 2*H*Dh)  bf16, cross-attn fused K|V
    cfw_ref,     # (H*Dh, Dh)   bf16, cross-attn output projection
    fcw_ref,     # (Dh, Dh)     bf16, final fc
    vecs_ref,    # (11, 3*H*Dh) f32 : all biases / LN gammas / LN betas
    o_ref,
    *, num_heads, hidden_dim,
):
    f32, bf16 = jnp.float32, jnp.bfloat16
    H, Dh = num_heads, hidden_dim
    HD = H * Dh

    Bt, S1, D = x1_ref.shape
    _, S2, _ = x2_ref.shape

    vecs = vecs_ref[...]                                   # (11, 3*HD) f32

    # flatten the batch tile: all row-wise math runs on (Bt*S, D) slabs
    x1 = x1_ref[...].reshape(Bt * S1, D).astype(f32)
    x2_bf = x2_ref[...].reshape(Bt * S2, D).astype(bf16)
    x1_bf = x1.astype(bf16)

    def attend(q_all, k_all, v_all, Sq, Sk, fw_bf, fb):
        # q_all: (Bt*Sq, HD) f32, k_all/v_all: (Bt*Sk, HD) f32
        outs = []
        for b in range(Bt):                 # static unroll (Bt, H both small)
            q_b = q_all[b * Sq:(b + 1) * Sq]
            k_b = k_all[b * Sk:(b + 1) * Sk]
            v_b = v_all[b * Sk:(b + 1) * Sk]
            heads = []
            for h in range(H):
                lo = h * Dh
                qh = q_b[:, lo:lo + Dh].astype(bf16)
                kh = k_b[:, lo:lo + Dh].astype(bf16)
                vh = v_b[:, lo:lo + Dh].astype(bf16)
                # contract the shared Dh axis directly (no K^T copy)
                s = lax.dot_general(qh, kh, (((1,), (1,)), ((), ())),
                                    preferred_element_type=f32)
                s = s - jnp.max(s, axis=-1, keepdims=True)
                p = jnp.exp(s)
                p = p * pl.reciprocal(jnp.sum(p, axis=-1, keepdims=True),
                                      approx=True)
                heads.append(jnp.dot(p.astype(bf16), vh,
                                     preferred_element_type=f32))
            outs.append(jnp.concatenate(heads, axis=-1))   # (Sq, HD)
        cat = outs[0] if Bt == 1 else jnp.concatenate(outs, axis=0)
        # single output projection, 128-deep contraction
        return (jnp.dot(cat.astype(bf16), fw_bf, preferred_element_type=f32)
                + fb[None, :])

    # ---------------- 1) self attention + residual + LN1 ----------------
    qkv = jnp.dot(x1_bf, swqkv_ref[...], preferred_element_type=f32) \
        + vecs[0][None, :]
    attn = attend(qkv[:, 0:HD], qkv[:, HD:2 * HD], qkv[:, 2 * HD:3 * HD],
                  S1, S1, sfw_ref[...], vecs[2, :Dh])
    x = _layernorm(attn + x1, vecs[3, :Dh], vecs[4, :Dh])

    # ---------------- 2) cross attention + residual + LN2 ---------------
    q = jnp.dot(x.astype(bf16), cwq_ref[...], preferred_element_type=f32) \
        + vecs[1, 0:HD][None, :]
    kv = jnp.dot(x2_bf, cwkv_ref[...], preferred_element_type=f32) \
        + vecs[1, HD:3 * HD][None, :]
    attn = attend(q, kv[:, 0:HD], kv[:, HD:2 * HD],
                  S1, S2, cfw_ref[...], vecs[5, :Dh])
    x = _layernorm(attn + x, vecs[6, :Dh], vecs[7, :Dh])

    # ---------------- 3) fc + residual + LN3 -----------------------------
    xp = jnp.dot(x.astype(bf16), fcw_ref[...], preferred_element_type=f32) \
        + vecs[8, :Dh][None, :]
    x = _layernorm(xp + x, vecs[9, :Dh], vecs[10, :Dh])

    o_ref[...] = x.reshape(Bt, S1, Dh).astype(o_ref.dtype)


def _pack_params(params, *, num_heads, hidden_dim, mxu_dtype=jnp.bfloat16):
    """Repack torch-style per-head params into lane-dense kernel layout."""
    (swq, sbq, swk, sbk, swv, sbv, sfw, sfb, g1, b1,
     cwq, cbq, cwk, cbk, cwv, cbv, cfw, cfb, g2, b2,
     fcw, fcb, g3, b3) = params
    H, Dh = num_heads, hidden_dim
    HD = H * Dh
    W = 3 * HD
    scale = 1.0 / (float(Dh) ** 0.5)

    def cat_w(w):   # (H, Din, Dh) -> (Din, H*Dh), head-blocks along lanes
        return jnp.transpose(w, (1, 0, 2)).reshape(w.shape[1], HD)

    def cat_b(b):   # (H, Dh) -> (H*Dh,)
        return b.reshape(HD)

    def pad(v):     # (Dh,) -> (3*HD,) zero-padded
        return jnp.pad(v, (0, W - v.shape[0]))

    # fused projection weights (softmax scale folded into Q)
    swqkv = jnp.concatenate(
        [cat_w(swq) * scale, cat_w(swk), cat_w(swv)], axis=1)        # (D, 3HD)
    cwq_p = cat_w(cwq) * scale                                       # (D, HD)
    cwkv = jnp.concatenate([cat_w(cwk), cat_w(cwv)], axis=1)         # (D, 2HD)

    # all 1-D params packed into one f32 block -> one DMA
    vecs = jnp.stack([
        jnp.concatenate([cat_b(sbq) * scale, cat_b(sbk), cat_b(sbv)]),  # 0
        jnp.concatenate([cat_b(cbq) * scale, cat_b(cbk), cat_b(cbv)]),  # 1
        pad(sfb), pad(g1), pad(b1),                                     # 2-4
        pad(cfb), pad(g2), pad(b2),                                     # 5-7
        pad(fcb), pad(g3), pad(b3),                                     # 8-10
    ]).astype(jnp.float32)

    to = lambda w: w.astype(mxu_dtype)
    return [to(swqkv), to(sfw), to(cwq_p), to(cwkv), to(cfw), to(fcw), vecs]


def decoder_forward(x1, x2, params, *, num_heads, hidden_dim, batch_tile=None):
    B, S1, D = x1.shape
    _, S2, D2 = x2.shape
    assert D == hidden_dim and D2 == D, \
        "residual adds require input_dim == hidden_dim"

    if batch_tile is None:
        # keep >= 2 grid steps when possible (v7x has 2 TensorCores) while
        # still batching rows to amortize per-grid-step fixed cost.
        batch_tile = B // 2 if (B >= 2 and B % 2 == 0) else 1
    assert B % batch_tile == 0
    Bt = batch_tile
    grid = (B // Bt,)

    packed = _pack_params(params, num_heads=num_heads, hidden_dim=hidden_dim)

    def full_spec(a):
        # grid-invariant weight blocks: constant index_map, not re-fetched
        zeros = (0,) * a.ndim
        return pl.BlockSpec(a.shape, lambda i, z=zeros: z)

    in_specs = [
        pl.BlockSpec((Bt, S1, D), lambda i: (i, 0, 0)),
        pl.BlockSpec((Bt, S2, D), lambda i: (i, 0, 0)),
    ] + [full_spec(w) for w in packed]

    kernel = functools.partial(decoder_kernel,
                               num_heads=num_heads, hidden_dim=hidden_dim)

    return pl.pallas_call(
        kernel,
        out_shape=jax.ShapeDtypeStruct((B, S1, hidden_dim), x1.dtype),
        grid_spec=pltpu.PrefetchScalarGridSpec(
            num_scalar_prefetch=0,
            grid=grid,
            in_specs=in_specs,
            out_specs=pl.BlockSpec((Bt, S1, hidden_dim), lambda i: (i, 0, 0)),
        ),
        compiler_params=pltpu.CompilerParams(
            dimension_semantics=("parallel",),
        ),
    )(x1, x2, *packed)


# ---------------- pure-JAX reference (torch-faithful, unpacked params) -------
def _layernorm_ref(x, gamma, beta, eps=1e-5):
    mu = jnp.mean(x, axis=-1, keepdims=True)
    var = jnp.mean((x - mu) ** 2, axis=-1, keepdims=True)
    return (x - mu) * lax.rsqrt(var + eps) * gamma + beta


def reference_forward(x1, x2, params, *, num_heads, hidden_dim):
    (swq, sbq, swk, sbk, swv, sbv, sfw, sfb, g1, b1,
     cwq, cbq, cwk, cbk, cwv, cbv, cfw, cfb, g2, b2,
     fcw, fcb, g3, b3) = params
    scale = 1.0 / jnp.sqrt(jnp.float32(hidden_dim))

    def mha(q_in, kv_in, wq, bq, wk, bk, wv, bv, fw, fb):
        outs = []
        for h in range(num_heads):
            q = q_in @ wq[h] + bq[h]
            k = kv_in @ wk[h] + bk[h]
            v = kv_in @ wv[h] + bv[h]
            p = jax.nn.softmax(q @ k.T * scale, axis=-1)
            outs.append(p @ v)
        return jnp.concatenate(outs, axis=-1) @ fw + fb

    def one(x1b, x2b):
        xp = mha(x1b, x1b, swq, sbq, swk, sbk, swv, sbv, sfw, sfb)
        x = _layernorm_ref(xp + x1b, g1, b1)
        xp = mha(x, x2b, cwq, cbq, cwk, cbk, cwv, cbv, cfw, cfb)
        x = _layernorm_ref(xp + x, g2, b2)
        xp = x @ fcw + fcb
        return _layernorm_ref(xp + x, g3, b3)

    return jax.vmap(one)(x1, x2)


def init_params(key, input_dim, hidden_dim, num_heads):
    D, Dh, H = input_dim, hidden_dim, num_heads
    ks = jax.random.split(key, 24)
    n = lambda k, shp: jax.random.normal(k, shp, jnp.float32) * 0.05
    ones = jnp.ones((Dh,), jnp.float32)
    params = [
        n(ks[0], (H, D, Dh)), n(ks[1], (H, Dh)),            # self Wq, bq
        n(ks[2], (H, D, Dh)), n(ks[3], (H, Dh)),            # self Wk, bk
        n(ks[4], (H, D, Dh)), n(ks[5], (H, Dh)),            # self Wv, bv
        n(ks[6], (H * Dh, Dh)), n(ks[7], (Dh,)),            # self out-proj
        ones + n(ks[16], (Dh,)), n(ks[17], (Dh,)),          # LN1 gamma, beta
        n(ks[8], (H, D, Dh)), n(ks[9], (H, Dh)),            # cross Wq, bq
        n(ks[10], (H, D, Dh)), n(ks[11], (H, Dh)),          # cross Wk, bk
        n(ks[12], (H, D, Dh)), n(ks[13], (H, Dh)),          # cross Wv, bv
        n(ks[14], (H * Dh, Dh)), n(ks[15], (Dh,)),          # cross out-proj
        ones + n(ks[18], (Dh,)), n(ks[19], (Dh,)),          # LN2 gamma, beta
        n(ks[20], (Dh, Dh)), n(ks[21], (Dh,)),              # fc W, b
        ones + n(ks[22], (Dh,)), n(ks[23], (Dh,)),          # LN3 gamma, beta
    ]
    return params


if __name__ == "__main__":
    B, S1, S2 = 4, 8, 8
    input_dim = hidden_dim = 32   # residual add requires input_dim == hidden_dim
    num_heads = 4                 # num_heads * hidden_dim = 128 (full MXU lane width)

    key = jax.random.PRNGKey(0)
    k1, k2, k3 = jax.random.split(key, 3)
    x1 = jax.random.normal(k1, (B, S1, input_dim), jnp.float32)
    x2 = jax.random.normal(k2, (B, S2, input_dim), jnp.float32)
    params = init_params(k3, input_dim, hidden_dim, num_heads)

    out = decoder_forward(x1, x2, params, num_heads=num_heads,
                          hidden_dim=hidden_dim)
    out = jax.block_until_ready(out)

    ref = reference_forward(x1, x2, params, num_heads=num_heads,
                            hidden_dim=hidden_dim)
    assert out.shape == (B, S1, hidden_dim)
    max_err = float(jnp.max(jnp.abs(out - ref)))
    # bf16 MXU operands + approx softmax reciprocal vs f32 reference
    assert jnp.allclose(out, ref, atol=5e-2, rtol=5e-2), (
        f"mismatch vs JAX reference (max abs err {max_err:.3e})")

    print("KERNEL_OK")
</pallas_src>

<mosaic_0001>
module attributes {stable_mosaic.version = 11 : i64} {
  func.func @decoder_kernel(%arg0: i32, %arg1: memref<2x8x32xf32, #tpu.memory_space<vmem>>, %arg2: memref<2x8x32xf32, #tpu.memory_space<vmem>>, %arg3: memref<32x384xbf16, #tpu.memory_space<vmem>>, %arg4: memref<128x32xbf16, #tpu.memory_space<vmem>>, %arg5: memref<32x128xbf16, #tpu.memory_space<vmem>>, %arg6: memref<32x256xbf16, #tpu.memory_space<vmem>>, %arg7: memref<128x32xbf16, #tpu.memory_space<vmem>>, %arg8: memref<32x32xbf16, #tpu.memory_space<vmem>>, %arg9: memref<11x384xf32, #tpu.memory_space<vmem>>, %arg10: memref<2x8x32xf32, #tpu.memory_space<vmem>>) attributes {dimension_semantics = [#tpu.dimension_semantics<parallel>], iteration_bounds = array<i64: 2>, scalar_prefetch = 0 : i64, scratch_operands = 0 : i64, tpu.core_type = #tpu.core_type<tc>, window_params = [{transform_indices = @transform_0, window_bounds = array<i64: 2, 8, 32>}, {transform_indices = @transform_1, window_bounds = array<i64: 2, 8, 32>}, {pipeline_mode = #tpu.pipeline_mode<synchronous>, transform_indices = @transform_2, window_bounds = array<i64: 32, 384>}, {pipeline_mode = #tpu.pipeline_mode<synchronous>, transform_indices = @transform_3, window_bounds = array<i64: 128, 32>}, {pipeline_mode = #tpu.pipeline_mode<synchronous>, transform_indices = @transform_4, window_bounds = array<i64: 32, 128>}, {pipeline_mode = #tpu.pipeline_mode<synchronous>, transform_indices = @transform_5, window_bounds = array<i64: 32, 256>}, {pipeline_mode = #tpu.pipeline_mode<synchronous>, transform_indices = @transform_6, window_bounds = array<i64: 128, 32>}, {pipeline_mode = #tpu.pipeline_mode<synchronous>, transform_indices = @transform_7, window_bounds = array<i64: 32, 32>}, {pipeline_mode = #tpu.pipeline_mode<synchronous>, transform_indices = @transform_8, window_bounds = array<i64: 11, 384>}, {transform_indices = @transform_9, window_bounds = array<i64: 2, 8, 32>}]} {
    %c0 = arith.constant 0 : index
    %c0_0 = arith.constant 0 : index
    %0 = vector.load %arg9[%c0, %c0_0] : memref<11x384xf32, #tpu.memory_space<vmem>>, vector<11x384xf32>
    %c0_1 = arith.constant 0 : index
    %c0_2 = arith.constant 0 : index
    %c0_3 = arith.constant 0 : index
    %1 = vector.load %arg1[%c0_1, %c0_2, %c0_3] : memref<2x8x32xf32, #tpu.memory_space<vmem>>, vector<2x8x32xf32>
    %2 = vector.shape_cast %1 : vector<2x8x32xf32> to vector<16x32xf32>
    %c0_4 = arith.constant 0 : index
    %c0_5 = arith.constant 0 : index
    %c0_6 = arith.constant 0 : index
    %3 = vector.load %arg2[%c0_4, %c0_5, %c0_6] : memref<2x8x32xf32, #tpu.memory_space<vmem>>, vector<2x8x32xf32>
    %4 = vector.shape_cast %3 : vector<2x8x32xf32> to vector<16x32xf32>
    %5 = arith.truncf %4 : vector<16x32xf32> to vector<16x32xbf16>
    %6 = arith.truncf %2 : vector<16x32xf32> to vector<16x32xbf16>
    %c0_7 = arith.constant 0 : index
    %c0_8 = arith.constant 0 : index
    %7 = vector.load %arg3[%c0_7, %c0_8] : memref<32x384xbf16, #tpu.memory_space<vmem>>, vector<32x384xbf16>
    %cst = arith.constant dense<0.000000e+00> : vector<16x384xf32>
    %8 = tpu.matmul %6, %7, %cst {dimension_numbers = #tpu.dot_dimension_numbers<[1], [0], [0], [1], [0, 0, 1, 1], [], []>} : vector<16x32xbf16>, vector<32x384xbf16>, vector<16x384xf32> -> vector<16x384xf32>
    %9 = vector.extract_strided_slice %0 {offsets = [0, 0], sizes = [1, 384], strides = [1, 1]} : vector<11x384xf32> to vector<1x384xf32>
    %10 = vector.shape_cast %9 : vector<1x384xf32> to vector<384xf32>
    %11 = vector.shape_cast %10 : vector<384xf32> to vector<1x384xf32>
    %12 = vector.broadcast %11 : vector<1x384xf32> to vector<16x384xf32>
    %13 = arith.addf %8, %12 : vector<16x384xf32>
    %14 = vector.extract_strided_slice %13 {offsets = [0, 0], sizes = [16, 128], strides = [1, 1]} : vector<16x384xf32> to vector<16x128xf32>
    %15 = vector.extract_strided_slice %13 {offsets = [0, 128], sizes = [16, 128], strides = [1, 1]} : vector<16x384xf32> to vector<16x128xf32>
    %16 = vector.extract_strided_slice %13 {offsets = [0, 256], sizes = [16, 128], strides = [1, 1]} : vector<16x384xf32> to vector<16x128xf32>
    %c0_9 = arith.constant 0 : index
    %c0_10 = arith.constant 0 : index
    %17 = vector.load %arg4[%c0_9, %c0_10] : memref<128x32xbf16, #tpu.memory_space<vmem>>, vector<128x32xbf16>
    %18 = vector.extract_strided_slice %0 {offsets = [2, 0], sizes = [1, 32], strides = [1, 1]} : vector<11x384xf32> to vector<1x32xf32>
    %19 = vector.shape_cast %18 : vector<1x32xf32> to vector<32xf32>
    %20 = vector.extract_strided_slice %14 {offsets = [0, 0], sizes = [8, 128], strides = [1, 1]} : vector<16x128xf32> to vector<8x128xf32>
    %21 = vector.extract_strided_slice %15 {offsets = [0, 0], sizes = [8, 128], strides = [1, 1]} : vector<16x128xf32> to vector<8x128xf32>
    %22 = vector.extract_strided_slice %16 {offsets = [0, 0], sizes = [8, 128], strides = [1, 1]} : vector<16x128xf32> to vector<8x128xf32>
    %23 = vector.extract_strided_slice %20 {offsets = [0, 0], sizes = [8, 32], strides = [1, 1]} : vector<8x128xf32> to vector<8x32xf32>
    %24 = arith.truncf %23 : vector<8x32xf32> to vector<8x32xbf16>
    %25 = vector.extract_strided_slice %21 {offsets = [0, 0], sizes = [8, 32], strides = [1, 1]} : vector<8x128xf32> to vector<8x32xf32>
    %26 = arith.truncf %25 : vector<8x32xf32> to vector<8x32xbf16>
    %27 = vector.extract_strided_slice %22 {offsets = [0, 0], sizes = [8, 32], strides = [1, 1]} : vector<8x128xf32> to vector<8x32xf32>
    %28 = arith.truncf %27 : vector<8x32xf32> to vector<8x32xbf16>
    %cst_11 = arith.constant dense<0.000000e+00> : vector<8x8xf32>
    %29 = tpu.matmul %24, %26, %cst_11 {dimension_numbers = #tpu.dot_dimension_numbers<[1], [1], [0], [0], [0, 0, 1, 0], [], []>} : vector<8x32xbf16>, vector<8x32xbf16>, vector<8x8xf32> -> vector<8x8xf32>
    %cst_12 = arith.constant dense<0xFF800000> : vector<8xf32>
    %30 = vector.multi_reduction <maximumf>, %29, %cst_12 [1] : vector<8x8xf32> to vector<8xf32>
    %31 = vector.shape_cast %30 : vector<8xf32> to vector<8x1xf32>
    %32 = vector.broadcast %31 : vector<8x1xf32> to vector<8x8xf32>
    %33 = arith.subf %29, %32 : vector<8x8xf32>
    %34 = math.exp %33 : vector<8x8xf32>
    %cst_13 = arith.constant dense<0.000000e+00> : vector<8xf32>
    %35 = vector.multi_reduction <add>, %34, %cst_13 [1] : vector<8x8xf32> to vector<8xf32>
    %36 = vector.shape_cast %35 : vector<8xf32> to vector<8x1xf32>
    %37 = tpu.reciprocal %36 {approx = true} : vector<8x1xf32> -> vector<8x1xf32>
    %38 = vector.broadcast %37 : vector<8x1xf32> to vector<8x8xf32>
    %39 = arith.mulf %34, %38 : vector<8x8xf32>
    %40 = arith.truncf %39 : vector<8x8xf32> to vector<8x8xbf16>
    %cst_14 = arith.constant dense<0.000000e+00> : vector<8x32xf32>
    %41 = tpu.matmul %40, %28, %cst_14 {dimension_numbers = #tpu.dot_dimension_numbers<[1], [0], [0], [1], [0, 0, 1, 1], [], []>} : vector<8x8xbf16>, vector<8x32xbf16>, vector<8x32xf32> -> vector<8x32xf32>
    %42 = vector.extract_strided_slice %20 {offsets = [0, 32], sizes = [8, 32], strides = [1, 1]} : vector<8x128xf32> to vector<8x32xf32>
    %43 = arith.truncf %42 : vector<8x32xf32> to vector<8x32xbf16>
    %44 = vector.extract_strided_slice %21 {offsets = [0, 32], sizes = [8, 32], strides = [1, 1]} : vector<8x128xf32> to vector<8x32xf32>
    %45 = arith.truncf %44 : vector<8x32xf32> to vector<8x32xbf16>
    %46 = vector.extract_strided_slice %22 {offsets = [0, 32], sizes = [8, 32], strides = [1, 1]} : vector<8x128xf32> to vector<8x32xf32>
    %47 = arith.truncf %46 : vector<8x32xf32> to vector<8x32xbf16>
    %cst_15 = arith.constant dense<0.000000e+00> : vector<8x8xf32>
    %48 = tpu.matmul %43, %45, %cst_15 {dimension_numbers = #tpu.dot_dimension_numbers<[1], [1], [0], [0], [0, 0, 1, 0], [], []>} : vector<8x32xbf16>, vector<8x32xbf16>, vector<8x8xf32> -> vector<8x8xf32>
    %cst_16 = arith.constant dense<0xFF800000> : vector<8xf32>
    %49 = vector.multi_reduction <maximumf>, %48, %cst_16 [1] : vector<8x8xf32> to vector<8xf32>
    %50 = vector.shape_cast %49 : vector<8xf32> to vector<8x1xf32>
    %51 = vector.broadcast %50 : vector<8x1xf32> to vector<8x8xf32>
    %52 = arith.subf %48, %51 : vector<8x8xf32>
    %53 = math.exp %52 : vector<8x8xf32>
    %cst_17 = arith.constant dense<0.000000e+00> : vector<8xf32>
    %54 = vector.multi_reduction <add>, %53, %cst_17 [1] : vector<8x8xf32> to vector<8xf32>
    %55 = vector.shape_cast %54 : vector<8xf32> to vector<8x1xf32>
    %56 = tpu.reciprocal %55 {approx = true} : vector<8x1xf32> -> vector<8x1xf32>
    %57 = vector.broadcast %56 : vector<8x1xf32> to vector<8x8xf32>
    %58 = arith.mulf %53, %57 : vector<8x8xf32>
    %59 = arith.truncf %58 : vector<8x8xf32> to vector<8x8xbf16>
    %cst_18 = arith.constant dense<0.000000e+00> : vector<8x32xf32>
    %60 = tpu.matmul %59, %47, %cst_18 {dimension_numbers = #tpu.dot_dimension_numbers<[1], [0], [0], [1], [0, 0, 1, 1], [], []>} : vector<8x8xbf16>, vector<8x32xbf16>, vector<8x32xf32> -> vector<8x32xf32>
    %61 = vector.extract_strided_slice %20 {offsets = [0, 64], sizes = [8, 32], strides = [1, 1]} : vector<8x128xf32> to vector<8x32xf32>
    %62 = arith.truncf %61 : vector<8x32xf32> to vector<8x32xbf16>
    %63 = vector.extract_strided_slice %21 {offsets = [0, 64], sizes = [8, 32], strides = [1, 1]} : vector<8x128xf32> to vector<8x32xf32>
    %64 = arith.truncf %63 : vector<8x32xf32> to vector<8x32xbf16>
    %65 = vector.extract_strided_slice %22 {offsets = [0, 64], sizes = [8, 32], strides = [1, 1]} : vector<8x128xf32> to vector<8x32xf32>
    %66 = arith.truncf %65 : vector<8x32xf32> to vector<8x32xbf16>
    %cst_19 = arith.constant dense<0.000000e+00> : vector<8x8xf32>
    %67 = tpu.matmul %62, %64, %cst_19 {dimension_numbers = #tpu.dot_dimension_numbers<[1], [1], [0], [0], [0, 0, 1, 0], [], []>} : vector<8x32xbf16>, vector<8x32xbf16>, vector<8x8xf32> -> vector<8x8xf32>
    %cst_20 = arith.constant dense<0xFF800000> : vector<8xf32>
    %68 = vector.multi_reduction <maximumf>, %67, %cst_20 [1] : vector<8x8xf32> to vector<8xf32>
    %69 = vector.shape_cast %68 : vector<8xf32> to vector<8x1xf32>
    %70 = vector.broadcast %69 : vector<8x1xf32> to vector<8x8xf32>
    %71 = arith.subf %67, %70 : vector<8x8xf32>
    %72 = math.exp %71 : vector<8x8xf32>
    %cst_21 = arith.constant dense<0.000000e+00> : vector<8xf32>
    %73 = vector.multi_reduction <add>, %72, %cst_21 [1] : vector<8x8xf32> to vector<8xf32>
    %74 = vector.shape_cast %73 : vector<8xf32> to vector<8x1xf32>
    %75 = tpu.reciprocal %74 {approx = true} : vector<8x1xf32> -> vector<8x1xf32>
    %76 = vector.broadcast %75 : vector<8x1xf32> to vector<8x8xf32>
    %77 = arith.mulf %72, %76 : vector<8x8xf32>
    %78 = arith.truncf %77 : vector<8x8xf32> to vector<8x8xbf16>
    %cst_22 = arith.constant dense<0.000000e+00> : vector<8x32xf32>
    %79 = tpu.matmul %78, %66, %cst_22 {dimension_numbers = #tpu.dot_dimension_numbers<[1], [0], [0], [1], [0, 0, 1, 1], [], []>} : vector<8x8xbf16>, vector<8x32xbf16>, vector<8x32xf32> -> vector<8x32xf32>
    %80 = vector.extract_strided_slice %20 {offsets = [0, 96], sizes = [8, 32], strides = [1, 1]} : vector<8x128xf32> to vector<8x32xf32>
    %81 = arith.truncf %80 : vector<8x32xf32> to vector<8x32xbf16>
    %82 = vector.extract_strided_slice %21 {offsets = [0, 96], sizes = [8, 32], strides = [1, 1]} : vector<8x128xf32> to vector<8x32xf32>
    %83 = arith.truncf %82 : vector<8x32xf32> to vector<8x32xbf16>
    %84 = vector.extract_strided_slice %22 {offsets = [0, 96], sizes = [8, 32], strides = [1, 1]} : vector<8x128xf32> to vector<8x32xf32>
    %85 = arith.truncf %84 : vector<8x32xf32> to vector<8x32xbf16>
    %cst_23 = arith.constant dense<0.000000e+00> : vector<8x8xf32>
    %86 = tpu.matmul %81, %83, %cst_23 {dimension_numbers = #tpu.dot_dimension_numbers<[1], [1], [0], [0], [0, 0, 1, 0], [], []>} : vector<8x32xbf16>, vector<8x32xbf16>, vector<8x8xf32> -> vector<8x8xf32>
    %cst_24 = arith.constant dense<0xFF800000> : vector<8xf32>
    %87 = vector.multi_reduction <maximumf>, %86, %cst_24 [1] : vector<8x8xf32> to vector<8xf32>
    %88 = vector.shape_cast %87 : vector<8xf32> to vector<8x1xf32>
    %89 = vector.broadcast %88 : vector<8x1xf32> to vector<8x8xf32>
    %90 = arith.subf %86, %89 : vector<8x8xf32>
    %91 = math.exp %90 : vector<8x8xf32>
    %cst_25 = arith.constant dense<0.000000e+00> : vector<8xf32>
    %92 = vector.multi_reduction <add>, %91, %cst_25 [1] : vector<8x8xf32> to vector<8xf32>
    %93 = vector.shape_cast %92 : vector<8xf32> to vector<8x1xf32>
    %94 = tpu.reciprocal %93 {approx = true} : vector<8x1xf32> -> vector<8x1xf32>
    %95 = vector.broadcast %94 : vector<8x1xf32> to vector<8x8xf32>
    %96 = arith.mulf %91, %95 : vector<8x8xf32>
    %97 = arith.truncf %96 : vector<8x8xf32> to vector<8x8xbf16>
    %cst_26 = arith.constant dense<0.000000e+00> : vector<8x32xf32>
    %98 = tpu.matmul %97, %85, %cst_26 {dimension_numbers = #tpu.dot_dimension_numbers<[1], [0], [0], [1], [0, 0, 1, 1], [], []>} : vector<8x8xbf16>, vector<8x32xbf16>, vector<8x32xf32> -> vector<8x32xf32>
    %99 = tpu.concatenate %41, %60, %79, %98 in 1 : vector<8x32xf32>, vector<8x32xf32>, vector<8x32xf32>, vector<8x32xf32> -> vector<8x128xf32>
    %100 = vector.extract_strided_slice %14 {offsets = [8, 0], sizes = [8, 128], strides = [1, 1]} : vector<16x128xf32> to vector<8x128xf32>
    %101 = vector.extract_strided_slice %15 {offsets = [8, 0], sizes = [8, 128], strides = [1, 1]} : vector<16x128xf32> to vector<8x128xf32>
    %102 = vector.extract_strided_slice %16 {offsets = [8, 0], sizes = [8, 128], strides = [1, 1]} : vector<16x128xf32> to vector<8x128xf32>
    %103 = vector.extract_strided_slice %100 {offsets = [0, 0], sizes = [8, 32], strides = [1, 1]} : vector<8x128xf32> to vector<8x32xf32>
    %104 = arith.truncf %103 : vector<8x32xf32> to vector<8x32xbf16>
    %105 = vector.extract_strided_slice %101 {offsets = [0, 0], sizes = [8, 32], strides = [1, 1]} : vector<8x128xf32> to vector<8x32xf32>
    %106 = arith.truncf %105 : vector<8x32xf32> to vector<8x32xbf16>
    %107 = vector.extract_strided_slice %102 {offsets = [0, 0], sizes = [8, 32], strides = [1, 1]} : vector<8x128xf32> to vector<8x32xf32>
    %108 = arith.truncf %107 : vector<8x32xf32> to vector<8x32xbf16>
    %cst_27 = arith.constant dense<0.000000e+00> : vector<8x8xf32>
    %109 = tpu.matmul %104, %106, %cst_27 {dimension_numbers = #tpu.dot_dimension_numbers<[1], [1], [0], [0], [0, 0, 1, 0], [], []>} : vector<8x32xbf16>, vector<8x32xbf16>, vector<8x8xf32> -> vector<8x8xf32>
    %cst_28 = arith.constant dense<0xFF800000> : vector<8xf32>
    %110 = vector.multi_reduction <maximumf>, %109, %cst_28 [1] : vector<8x8xf32> to vector<8xf32>
    %111 = vector.shape_cast %110 : vector<8xf32> to vector<8x1xf32>
    %112 = vector.broadcast %111 : vector<8x1xf32> to vector<8x8xf32>
    %113 = arith.subf %109, %112 : vector<8x8xf32>
    %114 = math.exp %113 : vector<8x8xf32>
    %cst_29 = arith.constant dense<0.000000e+00> : vector<8xf32>
    %115 = vector.multi_reduction <add>, %114, %cst_29 [1] : vector<8x8xf32> to vector<8xf32>
    %116 = vector.shape_cast %115 : vector<8xf32> to vector<8x1xf32>
    %117 = tpu.reciprocal %116 {approx = true} : vector<8x1xf32> -> vector<8x1xf32>
    %118 = vector.broadcast %117 : vector<8x1xf32> to vector<8x8xf32>
    %119 = arith.mulf %114, %118 : vector<8x8xf32>
    %120 = arith.truncf %119 : vector<8x8xf32> to vector<8x8xbf16>
    %cst_30 = arith.constant dense<0.000000e+00> : vector<8x32xf32>
    %121 = tpu.matmul %120, %108, %cst_30 {dimension_numbers = #tpu.dot_dimension_numbers<[1], [0], [0], [1], [0, 0, 1, 1], [], []>} : vector<8x8xbf16>, vector<8x32xbf16>, vector<8x32xf32> -> vector<8x32xf32>
    %122 = vector.extract_strided_slice %100 {offsets = [0, 32], sizes = [8, 32], strides = [1, 1]} : vector<8x128xf32> to vector<8x32xf32>
    %123 = arith.truncf %122 : vector<8x32xf32> to vector<8x32xbf16>
    %124 = vector.extract_strided_slice %101 {offsets = [0, 32], sizes = [8, 32], strides = [1, 1]} : vector<8x128xf32> to vector<8x32xf32>
    %125 = arith.truncf %124 : vector<8x32xf32> to vector<8x32xbf16>
    %126 = vector.extract_strided_slice %102 {offsets = [0, 32], sizes = [8, 32], strides = [1, 1]} : vector<8x128xf32> to vector<8x32xf32>
    %127 = arith.truncf %126 : vector<8x32xf32> to vector<8x32xbf16>
    %cst_31 = arith.constant dense<0.000000e+00> : vector<8x8xf32>
    %128 = tpu.matmul %123, %125, %cst_31 {dimension_numbers = #tpu.dot_dimension_numbers<[1], [1], [0], [0], [0, 0, 1, 0], [], []>} : vector<8x32xbf16>, vector<8x32xbf16>, vector<8x8xf32> -> vector<8x8xf32>
    %cst_32 = arith.constant dense<0xFF800000> : vector<8xf32>
    %129 = vector.multi_reduction <maximumf>, %128, %cst_32 [1] : vector<8x8xf32> to vector<8xf32>
    %130 = vector.shape_cast %129 : vector<8xf32> to vector<8x1xf32>
    %131 = vector.broadcast %130 : vector<8x1xf32> to vector<8x8xf32>
    %132 = arith.subf %128, %131 : vector<8x8xf32>
    %133 = math.exp %132 : vector<8x8xf32>
    %cst_33 = arith.constant dense<0.000000e+00> : vector<8xf32>
    %134 = vector.multi_reduction <add>, %133, %cst_33 [1] : vector<8x8xf32> to vector<8xf32>
    %135 = vector.shape_cast %134 : vector<8xf32> to vector<8x1xf32>
    %136 = tpu.reciprocal %135 {approx = true} : vector<8x1xf32> -> vector<8x1xf32>
    %137 = vector.broadcast %136 : vector<8x1xf32> to vector<8x8xf32>
    %138 = arith.mulf %133, %137 : vector<8x8xf32>
    %139 = arith.truncf %138 : vector<8x8xf32> to vector<8x8xbf16>
    %cst_34 = arith.constant dense<0.000000e+00> : vector<8x32xf32>
    %140 = tpu.matmul %139, %127, %cst_34 {dimension_numbers = #tpu.dot_dimension_numbers<[1], [0], [0], [1], [0, 0, 1, 1], [], []>} : vector<8x8xbf16>, vector<8x32xbf16>, vector<8x32xf32> -> vector<8x32xf32>
    %141 = vector.extract_strided_slice %100 {offsets = [0, 64], sizes = [8, 32], strides = [1, 1]} : vector<8x128xf32> to vector<8x32xf32>
    %142 = arith.truncf %141 : vector<8x32xf32> to vector<8x32xbf16>
    %143 = vector.extract_strided_slice %101 {offsets = [0, 64], sizes = [8, 32], strides = [1, 1]} : vector<8x128xf32> to vector<8x32xf32>
    %144 = arith.truncf %143 : vector<8x32xf32> to vector<8x32xbf16>
    %145 = vector.extract_strided_slice %102 {offsets = [0, 64], sizes = [8, 32], strides = [1, 1]} : vector<8x128xf32> to vector<8x32xf32>
    %146 = arith.truncf %145 : vector<8x32xf32> to vector<8x32xbf16>
    %cst_35 = arith.constant dense<0.000000e+00> : vector<8x8xf32>
    %147 = tpu.matmul %142, %144, %cst_35 {dimension_numbers = #tpu.dot_dimension_numbers<[1], [1], [0], [0], [0, 0, 1, 0], [], []>} : vector<8x32xbf16>, vector<8x32xbf16>, vector<8x8xf32> -> vector<8x8xf32>
    %cst_36 = arith.constant dense<0xFF800000> : vector<8xf32>
    %148 = vector.multi_reduction <maximumf>, %147, %cst_36 [1] : vector<8x8xf32> to vector<8xf32>
    %149 = vector.shape_cast %148 : vector<8xf32> to vector<8x1xf32>
    %150 = vector.broadcast %149 : vector<8x1xf32> to vector<8x8xf32>
    %151 = arith.subf %147, %150 : vector<8x8xf32>
    %152 = math.exp %151 : vector<8x8xf32>
    %cst_37 = arith.constant dense<0.000000e+00> : vector<8xf32>
    %153 = vector.multi_reduction <add>, %152, %cst_37 [1] : vector<8x8xf32> to vector<8xf32>
    %154 = vector.shape_cast %153 : vector<8xf32> to vector<8x1xf32>
    %155 = tpu.reciprocal %154 {approx = true} : vector<8x1xf32> -> vector<8x1xf32>
    %156 = vector.broadcast %155 : vector<8x1xf32> to vector<8x8xf32>
    %157 = arith.mulf %152, %156 : vector<8x8xf32>
    %158 = arith.truncf %157 : vector<8x8xf32> to vector<8x8xbf16>
    %cst_38 = arith.constant dense<0.000000e+00> : vector<8x32xf32>
    %159 = tpu.matmul %158, %146, %cst_38 {dimension_numbers = #tpu.dot_dimension_numbers<[1], [0], [0], [1], [0, 0, 1, 1], [], []>} : vector<8x8xbf16>, vector<8x32xbf16>, vector<8x32xf32> -> vector<8x32xf32>
    %160 = vector.extract_strided_slice %100 {offsets = [0, 96], sizes = [8, 32], strides = [1, 1]} : vector<8x128xf32> to vector<8x32xf32>
    %161 = arith.truncf %160 : vector<8x32xf32> to vector<8x32xbf16>
    %162 = vector.extract_strided_slice %101 {offsets = [0, 96], sizes = [8, 32], strides = [1, 1]} : vector<8x128xf32> to vector<8x32xf32>
    %163 = arith.truncf %162 : vector<8x32xf32> to vector<8x32xbf16>
    %164 = vector.extract_strided_slice %102 {offsets = [0, 96], sizes = [8, 32], strides = [1, 1]} : vector<8x128xf32> to vector<8x32xf32>
    %165 = arith.truncf %164 : vector<8x32xf32> to vector<8x32xbf16>
    %cst_39 = arith.constant dense<0.000000e+00> : vector<8x8xf32>
    %166 = tpu.matmul %161, %163, %cst_39 {dimension_numbers = #tpu.dot_dimension_numbers<[1], [1], [0], [0], [0, 0, 1, 0], [], []>} : vector<8x32xbf16>, vector<8x32xbf16>, vector<8x8xf32> -> vector<8x8xf32>
    %cst_40 = arith.constant dense<0xFF800000> : vector<8xf32>
    %167 = vector.multi_reduction <maximumf>, %166, %cst_40 [1] : vector<8x8xf32> to vector<8xf32>
    %168 = vector.shape_cast %167 : vector<8xf32> to vector<8x1xf32>
    %169 = vector.broadcast %168 : vector<8x1xf32> to vector<8x8xf32>
    %170 = arith.subf %166, %169 : vector<8x8xf32>
    %171 = math.exp %170 : vector<8x8xf32>
    %cst_41 = arith.constant dense<0.000000e+00> : vector<8xf32>
    %172 = vector.multi_reduction <add>, %171, %cst_41 [1] : vector<8x8xf32> to vector<8xf32>
    %173 = vector.shape_cast %172 : vector<8xf32> to vector<8x1xf32>
    %174 = tpu.reciprocal %173 {approx = true} : vector<8x1xf32> -> vector<8x1xf32>
    %175 = vector.broadcast %174 : vector<8x1xf32> to vector<8x8xf32>
    %176 = arith.mulf %171, %175 : vector<8x8xf32>
    %177 = arith.truncf %176 : vector<8x8xf32> to vector<8x8xbf16>
    %cst_42 = arith.constant dense<0.000000e+00> : vector<8x32xf32>
    %178 = tpu.matmul %177, %165, %cst_42 {dimension_numbers = #tpu.dot_dimension_numbers<[1], [0], [0], [1], [0, 0, 1, 1], [], []>} : vector<8x8xbf16>, vector<8x32xbf16>, vector<8x32xf32> -> vector<8x32xf32>
    %179 = tpu.concatenate %121, %140, %159, %178 in 1 : vector<8x32xf32>, vector<8x32xf32>, vector<8x32xf32>, vector<8x32xf32> -> vector<8x128xf32>
    %180 = tpu.concatenate %99, %179 in 0 : vector<8x128xf32>, vector<8x128xf32> -> vector<16x128xf32>
    %181 = arith.truncf %180 : vector<16x128xf32> to vector<16x128xbf16>
    %cst_43 = arith.constant dense<0.000000e+00> : vector<16x32xf32>
    %182 = tpu.matmul %181, %17, %cst_43 {dimension_numbers = #tpu.dot_dimension_numbers<[1], [0], [0], [1], [0, 0, 1, 1], [], []>} : vector<16x128xbf16>, vector<128x32xbf16>, vector<16x32xf32> -> vector<16x32xf32>
    %183 = vector.shape_cast %19 : vector<32xf32> to vector<1x32xf32>
    %184 = vector.broadcast %183 : vector<1x32xf32> to vector<16x32xf32>
    %185 = arith.addf %182, %184 : vector<16x32xf32>
    %186 = arith.addf %185, %2 : vector<16x32xf32>
    %187 = vector.extract_strided_slice %0 {offsets = [3, 0], sizes = [1, 32], strides = [1, 1]} : vector<11x384xf32> to vector<1x32xf32>
    %188 = vector.shape_cast %187 : vector<1x32xf32> to vector<32xf32>
    %189 = vector.extract_strided_slice %0 {offsets = [4, 0], sizes = [1, 32], strides = [1, 1]} : vector<11x384xf32> to vector<1x32xf32>
    %190 = vector.shape_cast %189 : vector<1x32xf32> to vector<32xf32>
    %cst_44 = arith.constant dense<0.000000e+00> : vector<16xf32>
    %191 = vector.multi_reduction <add>, %186, %cst_44 [1] : vector<16x32xf32> to vector<16xf32>
    %192 = vector.shape_cast %191 : vector<16xf32> to vector<16x1xf32>
    %cst_45 = arith.constant 3.200000e+01 : f32
    %193 = vector.broadcast %cst_45 : f32 to vector<16x1xf32>
    %194 = arith.divf %192, %193 : vector<16x1xf32>
    %195 = arith.mulf %186, %186 : vector<16x32xf32>
    %cst_46 = arith.constant dense<0.000000e+00> : vector<16xf32>
    %196 = vector.multi_reduction <add>, %195, %cst_46 [1] : vector<16x32xf32> to vector<16xf32>
    %197 = vector.shape_cast %196 : vector<16xf32> to vector<16x1xf32>
    %cst_47 = arith.constant 3.200000e+01 : f32
    %198 = vector.broadcast %cst_47 : f32 to vector<16x1xf32>
    %199 = arith.divf %197, %198 : vector<16x1xf32>
    %200 = arith.mulf %194, %194 : vector<16x1xf32>
    %201 = arith.subf %199, %200 : vector<16x1xf32>
    %202 = vector.broadcast %194 : vector<16x1xf32> to vector<16x32xf32>
    %203 = arith.subf %186, %202 : vector<16x32xf32>
    %cst_48 = arith.constant 9.99999974E-6 : f32
    %204 = vector.broadcast %cst_48 : f32 to vector<16x1xf32>
    %205 = arith.addf %201, %204 : vector<16x1xf32>
    %206 = math.rsqrt %205 : vector<16x1xf32>
    %207 = vector.broadcast %206 : vector<16x1xf32> to vector<16x32xf32>
    %208 = arith.mulf %203, %207 : vector<16x32xf32>
    %209 = vector.shape_cast %188 : vector<32xf32> to vector<1x32xf32>
    %210 = vector.broadcast %209 : vector<1x32xf32> to vector<16x32xf32>
    %211 = arith.mulf %208, %210 : vector<16x32xf32>
    %212 = vector.shape_cast %190 : vector<32xf32> to vector<1x32xf32>
    %213 = vector.broadcast %212 : vector<1x32xf32> to vector<16x32xf32>
    %214 = arith.addf %211, %213 : vector<16x32xf32>
    %215 = arith.truncf %214 : vector<16x32xf32> to vector<16x32xbf16>
    %c0_49 = arith.constant 0 : index
    %c0_50 = arith.constant 0 : index
    %216 = vector.load %arg5[%c0_49, %c0_50] : memref<32x128xbf16, #tpu.memory_space<vmem>>, vector<32x128xbf16>
    %cst_51 = arith.constant dense<0.000000e+00> : vector<16x128xf32>
    %217 = tpu.matmul %215, %216, %cst_51 {dimension_numbers = #tpu.dot_dimension_numbers<[1], [0], [0], [1], [0, 0, 1, 1], [], []>} : vector<16x32xbf16>, vector<32x128xbf16>, vector<16x128xf32> -> vector<16x128xf32>
    %218 = vector.extract_strided_slice %0 {offsets = [1, 0], sizes = [1, 128], strides = [1, 1]} : vector<11x384xf32> to vector<1x128xf32>
    %219 = vector.shape_cast %218 : vector<1x128xf32> to vector<128xf32>
    %220 = vector.shape_cast %219 : vector<128xf32> to vector<1x128xf32>
    %221 = vector.broadcast %220 : vector<1x128xf32> to vector<16x128xf32>
    %222 = arith.addf %217, %221 : vector<16x128xf32>
    %c0_52 = arith.constant 0 : index
    %c0_53 = arith.constant 0 : index
    %223 = vector.load %arg6[%c0_52, %c0_53] : memref<32x256xbf16, #tpu.memory_space<vmem>>, vector<32x256xbf16>
    %cst_54 = arith.constant dense<0.000000e+00> : vector<16x256xf32>
    %224 = tpu.matmul %5, %223, %cst_54 {dimension_numbers = #tpu.dot_dimension_numbers<[1], [0], [0], [1], [0, 0, 1, 1], [], []>} : vector<16x32xbf16>, vector<32x256xbf16>, vector<16x256xf32> -> vector<16x256xf32>
    %225 = vector.extract_strided_slice %0 {offsets = [1, 128], sizes = [1, 256], strides = [1, 1]} : vector<11x384xf32> to vector<1x256xf32>
    %226 = vector.shape_cast %225 : vector<1x256xf32> to vector<256xf32>
    %227 = vector.shape_cast %226 : vector<256xf32> to vector<1x256xf32>
    %228 = vector.broadcast %227 : vector<1x256xf32> to vector<16x256xf32>
    %229 = arith.addf %224, %228 : vector<16x256xf32>
    %230 = vector.extract_strided_slice %229 {offsets = [0, 0], sizes = [16, 128], strides = [1, 1]} : vector<16x256xf32> to vector<16x128xf32>
    %231 = vector.extract_strided_slice %229 {offsets = [0, 128], sizes = [16, 128], strides = [1, 1]} : vector<16x256xf32> to vector<16x128xf32>
    %c0_55 = arith.constant 0 : index
    %c0_56 = arith.constant 0 : index
    %232 = vector.load %arg7[%c0_55, %c0_56] : memref<128x32xbf16, #tpu.memory_space<vmem>>, vector<128x32xbf16>
    %233 = vector.extract_strided_slice %0 {offsets = [5, 0], sizes = [1, 32], strides = [1, 1]} : vector<11x384xf32> to vector<1x32xf32>
    %234 = vector.shape_cast %233 : vector<1x32xf32> to vector<32xf32>
    %235 = vector.extract_strided_slice %222 {offsets = [0, 0], sizes = [8, 128], strides = [1, 1]} : vector<16x128xf32> to vector<8x128xf32>
    %236 = vector.extract_strided_slice %230 {offsets = [0, 0], sizes = [8, 128], strides = [1, 1]} : vector<16x128xf32> to vector<8x128xf32>
    %237 = vector.extract_strided_slice %231 {offsets = [0, 0], sizes = [8, 128], strides = [1, 1]} : vector<16x128xf32> to vector<8x128xf32>
    %238 = vector.extract_strided_slice %235 {offsets = [0, 0], sizes = [8, 32], strides = [1, 1]} : vector<8x128xf32> to vector<8x32xf32>
    %239 = arith.truncf %238 : vector<8x32xf32> to vector<8x32xbf16>
    %240 = vector.extract_strided_slice %236 {offsets = [0, 0], sizes = [8, 32], strides = [1, 1]} : vector<8x128xf32> to vector<8x32xf32>
    %241 = arith.truncf %240 : vector<8x32xf32> to vector<8x32xbf16>
    %242 = vector.extract_strided_slice %237 {offsets = [0, 0], sizes = [8, 32], strides = [1, 1]} : vector<8x128xf32> to vector<8x32xf32>
    %243 = arith.truncf %242 : vector<8x32xf32> to vector<8x32xbf16>
    %cst_57 = arith.constant dense<0.000000e+00> : vector<8x8xf32>
    %244 = tpu.matmul %239, %241, %cst_57 {dimension_numbers = #tpu.dot_dimension_numbers<[1], [1], [0], [0], [0, 0, 1, 0], [], []>} : vector<8x32xbf16>, vector<8x32xbf16>, vector<8x8xf32> -> vector<8x8xf32>
    %cst_58 = arith.constant dense<0xFF800000> : vector<8xf32>
    %245 = vector.multi_reduction <maximumf>, %244, %cst_58 [1] : vector<8x8xf32> to vector<8xf32>
    %246 = vector.shape_cast %245 : vector<8xf32> to vector<8x1xf32>
    %247 = vector.broadcast %246 : vector<8x1xf32> to vector<8x8xf32>
    %248 = arith.subf %244, %247 : vector<8x8xf32>
    %249 = math.exp %248 : vector<8x8xf32>
    %cst_59 = arith.constant dense<0.000000e+00> : vector<8xf32>
    %250 = vector.multi_reduction <add>, %249, %cst_59 [1] : vector<8x8xf32> to vector<8xf32>
    %251 = vector.shape_cast %250 : vector<8xf32> to vector<8x1xf32>
    %252 = tpu.reciprocal %251 {approx = true} : vector<8x1xf32> -> vector<8x1xf32>
    %253 = vector.broadcast %252 : vector<8x1xf32> to vector<8x8xf32>
    %254 = arith.mulf %249, %253 : vector<8x8xf32>
    %255 = arith.truncf %254 : vector<8x8xf32> to vector<8x8xbf16>
    %cst_60 = arith.constant dense<0.000000e+00> : vector<8x32xf32>
    %256 = tpu.matmul %255, %243, %cst_60 {dimension_numbers = #tpu.dot_dimension_numbers<[1], [0], [0], [1], [0, 0, 1, 1], [], []>} : vector<8x8xbf16>, vector<8x32xbf16>, vector<8x32xf32> -> vector<8x32xf32>
    %257 = vector.extract_strided_slice %235 {offsets = [0, 32], sizes = [8, 32], strides = [1, 1]} : vector<8x128xf32> to vector<8x32xf32>
    %258 = arith.truncf %257 : vector<8x32xf32> to vector<8x32xbf16>
    %259 = vector.extract_strided_slice %236 {offsets = [0, 32], sizes = [8, 32], strides = [1, 1]} : vector<8x128xf32> to vector<8x32xf32>
    %260 = arith.truncf %259 : vector<8x32xf32> to vector<8x32xbf16>
    %261 = vector.extract_strided_slice %237 {offsets = [0, 32], sizes = [8, 32], strides = [1, 1]} : vector<8x128xf32> to vector<8x32xf32>
    %262 = arith.truncf %261 : vector<8x32xf32> to vector<8x32xbf16>
    %cst_61 = arith.constant dense<0.000000e+00> : vector<8x8xf32>
    %263 = tpu.matmul %258, %260, %cst_61 {dimension_numbers = #tpu.dot_dimension_numbers<[1], [1], [0], [0], [0, 0, 1, 0], [], []>} : vector<8x32xbf16>, vector<8x32xbf16>, vector<8x8xf32> -> vector<8x8xf32>
    %cst_62 = arith.constant dense<0xFF800000> : vector<8xf32>
    %264 = vector.multi_reduction <maximumf>, %263, %cst_62 [1] : vector<8x8xf32> to vector<8xf32>
    %265 = vector.shape_cast %264 : vector<8xf32> to vector<8x1xf32>
    %266 = vector.broadcast %265 : vector<8x1xf32> to vector<8x8xf32>
    %267 = arith.subf %263, %266 : vector<8x8xf32>
    %268 = math.exp %267 : vector<8x8xf32>
    %cst_63 = arith.constant dense<0.000000e+00> : vector<8xf32>
    %269 = vector.multi_reduction <add>, %268, %cst_63 [1] : vector<8x8xf32> to vector<8xf32>
    %270 = vector.shape_cast %269 : vector<8xf32> to vector<8x1xf32>
    %271 = tpu.reciprocal %270 {approx = true} : vector<8x1xf32> -> vector<8x1xf32>
    %272 = vector.broadcast %271 : vector<8x1xf32> to vector<8x8xf32>
    %273 = arith.mulf %268, %272 : vector<8x8xf32>
    %274 = arith.truncf %273 : vector<8x8xf32> to vector<8x8xbf16>
    %cst_64 = arith.constant dense<0.000000e+00> : vector<8x32xf32>
    %275 = tpu.matmul %274, %262, %cst_64 {dimension_numbers = #tpu.dot_dimension_numbers<[1], [0], [0], [1], [0, 0, 1, 1], [], []>} : vector<8x8xbf16>, vector<8x32xbf16>, vector<8x32xf32> -> vector<8x32xf32>
    %276 = vector.extract_strided_slice %235 {offsets = [0, 64], sizes = [8, 32], strides = [1, 1]} : vector<8x128xf32> to vector<8x32xf32>
    %277 = arith.truncf %276 : vector<8x32xf32> to vector<8x32xbf16>
    %278 = vector.extract_strided_slice %236 {offsets = [0, 64], sizes = [8, 32], strides = [1, 1]} : vector<8x128xf32> to vector<8x32xf32>
    %279 = arith.truncf %278 : vector<8x32xf32> to vector<8x32xbf16>
    %280 = vector.extract_strided_slice %237 {offsets = [0, 64], sizes = [8, 32], strides = [1, 1]} : vector<8x128xf32> to vector<8x32xf32>
    %281 = arith.truncf %280 : vector<8x32xf32> to vector<8x32xbf16>
    %cst_65 = arith.constant dense<0.000000e+00> : vector<8x8xf32>
    %282 = tpu.matmul %277, %279, %cst_65 {dimension_numbers = #tpu.dot_dimension_numbers<[1], [1], [0], [0], [0, 0, 1, 0], [], []>} : vector<8x32xbf16>, vector<8x32xbf16>, vector<8x8xf32> -> vector<8x8xf32>
    %cst_66 = arith.constant dense<0xFF800000> : vector<8xf32>
    %283 = vector.multi_reduction <maximumf>, %282, %cst_66 [1] : vector<8x8xf32> to vector<8xf32>
    %284 = vector.shape_cast %283 : vector<8xf32> to vector<8x1xf32>
    %285 = vector.broadcast %284 : vector<8x1xf32> to vector<8x8xf32>
    %286 = arith.subf %282, %285 : vector<8x8xf32>
    %287 = math.exp %286 : vector<8x8xf32>
    %cst_67 = arith.constant dense<0.000000e+00> : vector<8xf32>
    %288 = vector.multi_reduction <add>, %287, %cst_67 [1] : vector<8x8xf32> to vector<8xf32>
    %289 = vector.shape_cast %288 : vector<8xf32> to vector<8x1xf32>
    %290 = tpu.reciprocal %289 {approx = true} : vector<8x1xf32> -> vector<8x1xf32>
    %291 = vector.broadcast %290 : vector<8x1xf32> to vector<8x8xf32>
    %292 = arith.mulf %287, %291 : vector<8x8xf32>
    %293 = arith.truncf %292 : vector<8x8xf32> to vector<8x8xbf16>
    %cst_68 = arith.constant dense<0.000000e+00> : vector<8x32xf32>
    %294 = tpu.matmul %293, %281, %cst_68 {dimension_numbers = #tpu.dot_dimension_numbers<[1], [0], [0], [1], [0, 0, 1, 1], [], []>} : vector<8x8xbf16>, vector<8x32xbf16>, vector<8x32xf32> -> vector<8x32xf32>
    %295 = vector.extract_strided_slice %235 {offsets = [0, 96], sizes = [8, 32], strides = [1, 1]} : vector<8x128xf32> to vector<8x32xf32>
    %296 = arith.truncf %295 : vector<8x32xf32> to vector<8x32xbf16>
    %297 = vector.extract_strided_slice %236 {offsets = [0, 96], sizes = [8, 32], strides = [1, 1]} : vector<8x128xf32> to vector<8x32xf32>
    %298 = arith.truncf %297 : vector<8x32xf32> to vector<8x32xbf16>
    %299 = vector.extract_strided_slice %237 {offsets = [0, 96], sizes = [8, 32], strides = [1, 1]} : vector<8x128xf32> to vector<8x32xf32>
    %300 = arith.truncf %299 : vector<8x32xf32> to vector<8x32xbf16>
    %cst_69 = arith.constant dense<0.000000e+00> : vector<8x8xf32>
    %301 = tpu.matmul %296, %298, %cst_69 {dimension_numbers = #tpu.dot_dimension_numbers<[1], [1], [0], [0], [0, 0, 1, 0], [], []>} : vector<8x32xbf16>, vector<8x32xbf16>, vector<8x8xf32> -> vector<8x8xf32>
    %cst_70 = arith.constant dense<0xFF800000> : vector<8xf32>
    %302 = vector.multi_reduction <maximumf>, %301, %cst_70 [1] : vector<8x8xf32> to vector<8xf32>
    %303 = vector.shape_cast %302 : vector<8xf32> to vector<8x1xf32>
    %304 = vector.broadcast %303 : vector<8x1xf32> to vector<8x8xf32>
    %305 = arith.subf %301, %304 : vector<8x8xf32>
    %306 = math.exp %305 : vector<8x8xf32>
    %cst_71 = arith.constant dense<0.000000e+00> : vector<8xf32>
    %307 = vector.multi_reduction <add>, %306, %cst_71 [1] : vector<8x8xf32> to vector<8xf32>
    %308 = vector.shape_cast %307 : vector<8xf32> to vector<8x1xf32>
    %309 = tpu.reciprocal %308 {approx = true} : vector<8x1xf32> -> vector<8x1xf32>
    %310 = vector.broadcast %309 : vector<8x1xf32> to vector<8x8xf32>
    %311 = arith.mulf %306, %310 : vector<8x8xf32>
    %312 = arith.truncf %311 : vector<8x8xf32> to vector<8x8xbf16>
    %cst_72 = arith.constant dense<0.000000e+00> : vector<8x32xf32>
    %313 = tpu.matmul %312, %300, %cst_72 {dimension_numbers = #tpu.dot_dimension_numbers<[1], [0], [0], [1], [0, 0, 1, 1], [], []>} : vector<8x8xbf16>, vector<8x32xbf16>, vector<8x32xf32> -> vector<8x32xf32>
    %314 = tpu.concatenate %256, %275, %294, %313 in 1 : vector<8x32xf32>, vector<8x32xf32>, vector<8x32xf32>, vector<8x32xf32> -> vector<8x128xf32>
    %315 = vector.extract_strided_slice %222 {offsets = [8, 0], sizes = [8, 128], strides = [1, 1]} : vector<16x128xf32> to vector<8x128xf32>
    %316 = vector.extract_strided_slice %230 {offsets = [8, 0], sizes = [8, 128], strides = [1, 1]} : vector<16x128xf32> to vector<8x128xf32>
    %317 = vector.extract_strided_slice %231 {offsets = [8, 0], sizes = [8, 128], strides = [1, 1]} : vector<16x128xf32> to vector<8x128xf32>
    %318 = vector.extract_strided_slice %315 {offsets = [0, 0], sizes = [8, 32], strides = [1, 1]} : vector<8x128xf32> to vector<8x32xf32>
    %319 = arith.truncf %318 : vector<8x32xf32> to vector<8x32xbf16>
    %320 = vector.extract_strided_slice %316 {offsets = [0, 0], sizes = [8, 32], strides = [1, 1]} : vector<8x128xf32> to vector<8x32xf32>
    %321 = arith.truncf %320 : vector<8x32xf32> to vector<8x32xbf16>
    %322 = vector.extract_strided_slice %317 {offsets = [0, 0], sizes = [8, 32], strides = [1, 1]} : vector<8x128xf32> to vector<8x32xf32>
    %323 = arith.truncf %322 : vector<8x32xf32> to vector<8x32xbf16>
    %cst_73 = arith.constant dense<0.000000e+00> : vector<8x8xf32>
    %324 = tpu.matmul %319, %321, %cst_73 {dimension_numbers = #tpu.dot_dimension_numbers<[1], [1], [0], [0], [0, 0, 1, 0], [], []>} : vector<8x32xbf16>, vector<8x32xbf16>, vector<8x8xf32> -> vector<8x8xf32>
    %cst_74 = arith.constant dense<0xFF800000> : vector<8xf32>
    %325 = vector.multi_reduction <maximumf>, %324, %cst_74 [1] : vector<8x8xf32> to vector<8xf32>
    %326 = vector.shape_cast %325 : vector<8xf32> to vector<8x1xf32>
    %327 = vector.broadcast %326 : vector<8x1xf32> to vector<8x8xf32>
    %328 = arith.subf %324, %327 : vector<8x8xf32>
    %329 = math.exp %328 : vector<8x8xf32>
    %cst_75 = arith.constant dense<0.000000e+00> : vector<8xf32>
    %330 = vector.multi_reduction <add>, %329, %cst_75 [1] : vector<8x8xf32> to vector<8xf32>
    %331 = vector.shape_cast %330 : vector<8xf32> to vector<8x1xf32>
    %332 = tpu.reciprocal %331 {approx = true} : vector<8x1xf32> -> vector<8x1xf32>
    %333 = vector.broadcast %332 : vector<8x1xf32> to vector<8x8xf32>
    %334 = arith.mulf %329, %333 : vector<8x8xf32>
    %335 = arith.truncf %334 : vector<8x8xf32> to vector<8x8xbf16>
    %cst_76 = arith.constant dense<0.000000e+00> : vector<8x32xf32>
    %336 = tpu.matmul %335, %323, %cst_76 {dimension_numbers = #tpu.dot_dimension_numbers<[1], [0], [0], [1], [0, 0, 1, 1], [], []>} : vector<8x8xbf16>, vector<8x32xbf16>, vector<8x32xf32> -> vector<8x32xf32>
    %337 = vector.extract_strided_slice %315 {offsets = [0, 32], sizes = [8, 32], strides = [1, 1]} : vector<8x128xf32> to vector<8x32xf32>
    %338 = arith.truncf %337 : vector<8x32xf32> to vector<8x32xbf16>
    %339 = vector.extract_strided_slice %316 {offsets = [0, 32], sizes = [8, 32], strides = [1, 1]} : vector<8x128xf32> to vector<8x32xf32>
    %340 = arith.truncf %339 : vector<8x32xf32> to vector<8x32xbf16>
    %341 = vector.extract_strided_slice %317 {offsets = [0, 32], sizes = [8, 32], strides = [1, 1]} : vector<8x128xf32> to vector<8x32xf32>
    %342 = arith.truncf %341 : vector<8x32xf32> to vector<8x32xbf16>
    %cst_77 = arith.constant dense<0.000000e+00> : vector<8x8xf32>
    %343 = tpu.matmul %338, %340, %cst_77 {dimension_numbers = #tpu.dot_dimension_numbers<[1], [1], [0], [0], [0, 0, 1, 0], [], []>} : vector<8x32xbf16>, vector<8x32xbf16>, vector<8x8xf32> -> vector<8x8xf32>
    %cst_78 = arith.constant dense<0xFF800000> : vector<8xf32>
    %344 = vector.multi_reduction <maximumf>, %343, %cst_78 [1] : vector<8x8xf32> to vector<8xf32>
    %345 = vector.shape_cast %344 : vector<8xf32> to vector<8x1xf32>
    %346 = vector.broadcast %345 : vector<8x1xf32> to vector<8x8xf32>
    %347 = arith.subf %343, %346 : vector<8x8xf32>
    %348 = math.exp %347 : vector<8x8xf32>
    %cst_79 = arith.constant dense<0.000000e+00> : vector<8xf32>
    %349 = vector.multi_reduction <add>, %348, %cst_79 [1] : vector<8x8xf32> to vector<8xf32>
    %350 = vector.shape_cast %349 : vector<8xf32> to vector<8x1xf32>
    %351 = tpu.reciprocal %350 {approx = true} : vector<8x1xf32> -> vector<8x1xf32>
    %352 = vector.broadcast %351 : vector<8x1xf32> to vector<8x8xf32>
    %353 = arith.mulf %348, %352 : vector<8x8xf32>
    %354 = arith.truncf %353 : vector<8x8xf32> to vector<8x8xbf16>
    %cst_80 = arith.constant dense<0.000000e+00> : vector<8x32xf32>
    %355 = tpu.matmul %354, %342, %cst_80 {dimension_numbers = #tpu.dot_dimension_numbers<[1], [0], [0], [1], [0, 0, 1, 1], [], []>} : vector<8x8xbf16>, vector<8x32xbf16>, vector<8x32xf32> -> vector<8x32xf32>
    %356 = vector.extract_strided_slice %315 {offsets = [0, 64], sizes = [8, 32], strides = [1, 1]} : vector<8x128xf32> to vector<8x32xf32>
    %357 = arith.truncf %356 : vector<8x32xf32> to vector<8x32xbf16>
    %358 = vector.extract_strided_slice %316 {offsets = [0, 64], sizes = [8, 32], strides = [1, 1]} : vector<8x128xf32> to vector<8x32xf32>
    %359 = arith.truncf %358 : vector<8x32xf32> to vector<8x32xbf16>
    %360 = vector.extract_strided_slice %317 {offsets = [0, 64], sizes = [8, 32], strides = [1, 1]} : vector<8x128xf32> to vector<8x32xf32>
    %361 = arith.truncf %360 : vector<8x32xf32> to vector<8x32xbf16>
    %cst_81 = arith.constant dense<0.000000e+00> : vector<8x8xf32>
    %362 = tpu.matmul %357, %359, %cst_81 {dimension_numbers = #tpu.dot_dimension_numbers<[1], [1], [0], [0], [0, 0, 1, 0], [], []>} : vector<8x32xbf16>, vector<8x32xbf16>, vector<8x8xf32> -> vector<8x8xf32>
    %cst_82 = arith.constant dense<0xFF800000> : vector<8xf32>
    %363 = vector.multi_reduction <maximumf>, %362, %cst_82 [1] : vector<8x8xf32> to vector<8xf32>
    %364 = vector.shape_cast %363 : vector<8xf32> to vector<8x1xf32>
    %365 = vector.broadcast %364 : vector<8x1xf32> to vector<8x8xf32>
    %366 = arith.subf %362, %365 : vector<8x8xf32>
    %367 = math.exp %366 : vector<8x8xf32>
    %cst_83 = arith.constant dense<0.000000e+00> : vector<8xf32>
    %368 = vector.multi_reduction <add>, %367, %cst_83 [1] : vector<8x8xf32> to vector<8xf32>
    %369 = vector.shape_cast %368 : vector<8xf32> to vector<8x1xf32>
    %370 = tpu.reciprocal %369 {approx = true} : vector<8x1xf32> -> vector<8x1xf32>
    %371 = vector.broadcast %370 : vector<8x1xf32> to vector<8x8xf32>
    %372 = arith.mulf %367, %371 : vector<8x8xf32>
    %373 = arith.truncf %372 : vector<8x8xf32> to vector<8x8xbf16>
    %cst_84 = arith.constant dense<0.000000e+00> : vector<8x32xf32>
    %374 = tpu.matmul %373, %361, %cst_84 {dimension_numbers = #tpu.dot_dimension_numbers<[1], [0], [0], [1], [0, 0, 1, 1], [], []>} : vector<8x8xbf16>, vector<8x32xbf16>, vector<8x32xf32> -> vector<8x32xf32>
    %375 = vector.extract_strided_slice %315 {offsets = [0, 96], sizes = [8, 32], strides = [1, 1]} : vector<8x128xf32> to vector<8x32xf32>
    %376 = arith.truncf %375 : vector<8x32xf32> to vector<8x32xbf16>
    %377 = vector.extract_strided_slice %316 {offsets = [0, 96], sizes = [8, 32], strides = [1, 1]} : vector<8x128xf32> to vector<8x32xf32>
    %378 = arith.truncf %377 : vector<8x32xf32> to vector<8x32xbf16>
    %379 = vector.extract_strided_slice %317 {offsets = [0, 96], sizes = [8, 32], strides = [1, 1]} : vector<8x128xf32> to vector<8x32xf32>
    %380 = arith.truncf %379 : vector<8x32xf32> to vector<8x32xbf16>
    %cst_85 = arith.constant dense<0.000000e+00> : vector<8x8xf32>
    %381 = tpu.matmul %376, %378, %cst_85 {dimension_numbers = #tpu.dot_dimension_numbers<[1], [1], [0], [0], [0, 0, 1, 0], [], []>} : vector<8x32xbf16>, vector<8x32xbf16>, vector<8x8xf32> -> vector<8x8xf32>
    %cst_86 = arith.constant dense<0xFF800000> : vector<8xf32>
    %382 = vector.multi_reduction <maximumf>, %381, %cst_86 [1] : vector<8x8xf32> to vector<8xf32>
    %383 = vector.shape_cast %382 : vector<8xf32> to vector<8x1xf32>
    %384 = vector.broadcast %383 : vector<8x1xf32> to vector<8x8xf32>
    %385 = arith.subf %381, %384 : vector<8x8xf32>
    %386 = math.exp %385 : vector<8x8xf32>
    %cst_87 = arith.constant dense<0.000000e+00> : vector<8xf32>
    %387 = vector.multi_reduction <add>, %386, %cst_87 [1] : vector<8x8xf32> to vector<8xf32>
    %388 = vector.shape_cast %387 : vector<8xf32> to vector<8x1xf32>
    %389 = tpu.reciprocal %388 {approx = true} : vector<8x1xf32> -> vector<8x1xf32>
    %390 = vector.broadcast %389 : vector<8x1xf32> to vector<8x8xf32>
    %391 = arith.mulf %386, %390 : vector<8x8xf32>
    %392 = arith.truncf %391 : vector<8x8xf32> to vector<8x8xbf16>
    %cst_88 = arith.constant dense<0.000000e+00> : vector<8x32xf32>
    %393 = tpu.matmul %392, %380, %cst_88 {dimension_numbers = #tpu.dot_dimension_numbers<[1], [0], [0], [1], [0, 0, 1, 1], [], []>} : vector<8x8xbf16>, vector<8x32xbf16>, vector<8x32xf32> -> vector<8x32xf32>
    %394 = tpu.concatenate %336, %355, %374, %393 in 1 : vector<8x32xf32>, vector<8x32xf32>, vector<8x32xf32>, vector<8x32xf32> -> vector<8x128xf32>
    %395 = tpu.concatenate %314, %394 in 0 : vector<8x128xf32>, vector<8x128xf32> -> vector<16x128xf32>
    %396 = arith.truncf %395 : vector<16x128xf32> to vector<16x128xbf16>
    %cst_89 = arith.constant dense<0.000000e+00> : vector<16x32xf32>
    %397 = tpu.matmul %396, %232, %cst_89 {dimension_numbers = #tpu.dot_dimension_numbers<[1], [0], [0], [1], [0, 0, 1, 1], [], []>} : vector<16x128xbf16>, vector<128x32xbf16>, vector<16x32xf32> -> vector<16x32xf32>
    %398 = vector.shape_cast %234 : vector<32xf32> to vector<1x32xf32>
    %399 = vector.broadcast %398 : vector<1x32xf32> to vector<16x32xf32>
    %400 = arith.addf %397, %399 : vector<16x32xf32>
    %401 = arith.addf %400, %214 : vector<16x32xf32>
    %402 = vector.extract_strided_slice %0 {offsets = [6, 0], sizes = [1, 32], strides = [1, 1]} : vector<11x384xf32> to vector<1x32xf32>
    %403 = vector.shape_cast %402 : vector<1x32xf32> to vector<32xf32>
    %404 = vector.extract_strided_slice %0 {offsets = [7, 0], sizes = [1, 32], strides = [1, 1]} : vector<11x384xf32> to vector<1x32xf32>
    %405 = vector.shape_cast %404 : vector<1x32xf32> to vector<32xf32>
    %cst_90 = arith.constant dense<0.000000e+00> : vector<16xf32>
    %406 = vector.multi_reduction <add>, %401, %cst_90 [1] : vector<16x32xf32> to vector<16xf32>
    %407 = vector.shape_cast %406 : vector<16xf32> to vector<16x1xf32>
    %cst_91 = arith.constant 3.200000e+01 : f32
    %408 = vector.broadcast %cst_91 : f32 to vector<16x1xf32>
    %409 = arith.divf %407, %408 : vector<16x1xf32>
    %410 = arith.mulf %401, %401 : vector<16x32xf32>
    %cst_92 = arith.constant dense<0.000000e+00> : vector<16xf32>
    %411 = vector.multi_reduction <add>, %410, %cst_92 [1] : vector<16x32xf32> to vector<16xf32>
    %412 = vector.shape_cast %411 : vector<16xf32> to vector<16x1xf32>
    %cst_93 = arith.constant 3.200000e+01 : f32
    %413 = vector.broadcast %cst_93 : f32 to vector<16x1xf32>
    %414 = arith.divf %412, %413 : vector<16x1xf32>
    %415 = arith.mulf %409, %409 : vector<16x1xf32>
    %416 = arith.subf %414, %415 : vector<16x1xf32>
    %417 = vector.broadcast %409 : vector<16x1xf32> to vector<16x32xf32>
    %418 = arith.subf %401, %417 : vector<16x32xf32>
    %cst_94 = arith.constant 9.99999974E-6 : f32
    %419 = vector.broadcast %cst_94 : f32 to vector<16x1xf32>
    %420 = arith.addf %416, %419 : vector<16x1xf32>
    %421 = math.rsqrt %420 : vector<16x1xf32>
    %422 = vector.broadcast %421 : vector<16x1xf32> to vector<16x32xf32>
    %423 = arith.mulf %418, %422 : vector<16x32xf32>
    %424 = vector.shape_cast %403 : vector<32xf32> to vector<1x32xf32>
    %425 = vector.broadcast %424 : vector<1x32xf32> to vector<16x32xf32>
    %426 = arith.mulf %423, %425 : vector<16x32xf32>
    %427 = vector.shape_cast %405 : vector<32xf32> to vector<1x32xf32>
    %428 = vector.broadcast %427 : vector<1x32xf32> to vector<16x32xf32>
    %429 = arith.addf %426, %428 : vector<16x32xf32>
    %430 = arith.truncf %429 : vector<16x32xf32> to vector<16x32xbf16>
    %c0_95 = arith.constant 0 : index
    %c0_96 = arith.constant 0 : index
    %431 = vector.load %arg8[%c0_95, %c0_96] : memref<32x32xbf16, #tpu.memory_space<vmem>>, vector<32x32xbf16>
    %cst_97 = arith.constant dense<0.000000e+00> : vector<16x32xf32>
    %432 = tpu.matmul %430, %431, %cst_97 {dimension_numbers = #tpu.dot_dimension_numbers<[1], [0], [0], [1], [0, 0, 1, 1], [], []>} : vector<16x32xbf16>, vector<32x32xbf16>, vector<16x32xf32> -> vector<16x32xf32>
    %433 = vector.extract_strided_slice %0 {offsets = [8, 0], sizes = [1, 32], strides = [1, 1]} : vector<11x384xf32> to vector<1x32xf32>
    %434 = vector.shape_cast %433 : vector<1x32xf32> to vector<32xf32>
    %435 = vector.shape_cast %434 : vector<32xf32> to vector<1x32xf32>
    %436 = vector.broadcast %435 : vector<1x32xf32> to vector<16x32xf32>
    %437 = arith.addf %432, %436 : vector<16x32xf32>
    %438 = arith.addf %437, %429 : vector<16x32xf32>
    %439 = vector.extract_strided_slice %0 {offsets = [9, 0], sizes = [1, 32], strides = [1, 1]} : vector<11x384xf32> to vector<1x32xf32>
    %440 = vector.shape_cast %439 : vector<1x32xf32> to vector<32xf32>
    %441 = vector.extract_strided_slice %0 {offsets = [10, 0], sizes = [1, 32], strides = [1, 1]} : vector<11x384xf32> to vector<1x32xf32>
    %442 = vector.shape_cast %441 : vector<1x32xf32> to vector<32xf32>
    %cst_98 = arith.constant dense<0.000000e+00> : vector<16xf32>
    %443 = vector.multi_reduction <add>, %438, %cst_98 [1] : vector<16x32xf32> to vector<16xf32>
    %444 = vector.shape_cast %443 : vector<16xf32> to vector<16x1xf32>
    %cst_99 = arith.constant 3.200000e+01 : f32
    %445 = vector.broadcast %cst_99 : f32 to vector<16x1xf32>
    %446 = arith.divf %444, %445 : vector<16x1xf32>
    %447 = arith.mulf %438, %438 : vector<16x32xf32>
    %cst_100 = arith.constant dense<0.000000e+00> : vector<16xf32>
    %448 = vector.multi_reduction <add>, %447, %cst_100 [1] : vector<16x32xf32> to vector<16xf32>
    %449 = vector.shape_cast %448 : vector<16xf32> to vector<16x1xf32>
    %cst_101 = arith.constant 3.200000e+01 : f32
    %450 = vector.broadcast %cst_101 : f32 to vector<16x1xf32>
    %451 = arith.divf %449, %450 : vector<16x1xf32>
    %452 = arith.mulf %446, %446 : vector<16x1xf32>
    %453 = arith.subf %451, %452 : vector<16x1xf32>
    %454 = vector.broadcast %446 : vector<16x1xf32> to vector<16x32xf32>
    %455 = arith.subf %438, %454 : vector<16x32xf32>
    %cst_102 = arith.constant 9.99999974E-6 : f32
    %456 = vector.broadcast %cst_102 : f32 to vector<16x1xf32>
    %457 = arith.addf %453, %456 : vector<16x1xf32>
    %458 = math.rsqrt %457 : vector<16x1xf32>
    %459 = vector.broadcast %458 : vector<16x1xf32> to vector<16x32xf32>
    %460 = arith.mulf %455, %459 : vector<16x32xf32>
    %461 = vector.shape_cast %440 : vector<32xf32> to vector<1x32xf32>
    %462 = vector.broadcast %461 : vector<1x32xf32> to vector<16x32xf32>
    %463 = arith.mulf %460, %462 : vector<16x32xf32>
    %464 = vector.shape_cast %442 : vector<32xf32> to vector<1x32xf32>
    %465 = vector.broadcast %464 : vector<1x32xf32> to vector<16x32xf32>
    %466 = arith.addf %463, %465 : vector<16x32xf32>
    %467 = vector.shape_cast %466 : vector<16x32xf32> to vector<2x8x32xf32>
    %c0_103 = arith.constant 0 : index
    %c0_104 = arith.constant 0 : index
    %c0_105 = arith.constant 0 : index
    %468 = vector.load %arg10[%c0_103, %c0_104, %c0_105] : memref<2x8x32xf32, #tpu.memory_space<vmem>>, vector<2x8x32xf32>
    tpu.vector_store %arg10[%c0_103, %c0_104, %c0_105], %467 {strides = array<i32>} : memref<2x8x32xf32, #tpu.memory_space<vmem>>, vector<2x8x32xf32>,
    return
  }
  func.func @transform_0(%arg0: i32) -> (i32, i32, i32) {
    %c0_i32 = arith.constant 0 : i32
    %c0_i32_0 = arith.constant 0 : i32
    %c0_i32_1 = arith.constant 0 : i32
    return %arg0, %c0_i32, %c0_i32_0 : i32, i32, i32
  }
  func.func @transform_1(%arg0: i32) -> (i32, i32, i32) {
    %c0_i32 = arith.constant 0 : i32
    %c0_i32_0 = arith.constant 0 : i32
    %c0_i32_1 = arith.constant 0 : i32
    return %arg0, %c0_i32, %c0_i32_0 : i32, i32, i32
  }
  func.func @transform_2(%arg0: i32) -> (i32, i32) {
    %c0_i32 = arith.constant 0 : i32
    %c0_i32_0 = arith.constant 0 : i32
    %c0_i32_1 = arith.constant 0 : i32
    return %c0_i32, %c0_i32_0 : i32, i32
  }
  func.func @transform_3(%arg0: i32) -> (i32, i32) {
    %c0_i32 = arith.constant 0 : i32
    %c0_i32_0 = arith.constant 0 : i32
    %c0_i32_1 = arith.constant 0 : i32
    return %c0_i32, %c0_i32_0 : i32, i32
  }
  func.func @transform_4(%arg0: i32) -> (i32, i32) {
    %c0_i32 = arith.constant 0 : i32
    %c0_i32_0 = arith.constant 0 : i32
    %c0_i32_1 = arith.constant 0 : i32
    return %c0_i32, %c0_i32_0 : i32, i32
  }
  func.func @transform_5(%arg0: i32) -> (i32, i32) {
    %c0_i32 = arith.constant 0 : i32
    %c0_i32_0 = arith.constant 0 : i32
    %c0_i32_1 = arith.constant 0 : i32
    return %c0_i32, %c0_i32_0 : i32, i32
  }
  func.func @transform_6(%arg0: i32) -> (i32, i32) {
    %c0_i32 = arith.constant 0 : i32
    %c0_i32_0 = arith.constant 0 : i32
    %c0_i32_1 = arith.constant 0 : i32
    return %c0_i32, %c0_i32_0 : i32, i32
  }
  func.func @transform_7(%arg0: i32) -> (i32, i32) {
    %c0_i32 = arith.constant 0 : i32
    %c0_i32_0 = arith.constant 0 : i32
    %c0_i32_1 = arith.constant 0 : i32
    return %c0_i32, %c0_i32_0 : i32, i32
  }
  func.func @transform_8(%arg0: i32) -> (i32, i32) {
    %c0_i32 = arith.constant 0 : i32
    %c0_i32_0 = arith.constant 0 : i32
    %c0_i32_1 = arith.constant 0 : i32
    return %c0_i32, %c0_i32_0 : i32, i32
  }
  func.func @transform_9(%arg0: i32) -> (i32, i32, i32) {
    %c0_i32 = arith.constant 0 : i32
    %c0_i32_0 = arith.constant 0 : i32
    %c0_i32_1 = arith.constant 0 : i32
    return %arg0, %c0_i32, %c0_i32_0 : i32, i32, i32
  }
}

</mosaic_0001>

<bundles_post_ra>
// kernel: tpu_custom_call.1
= control target key start
LH: loop header
LB: loop body
LE: loop exit
PB: predicated region body
PF: predicated region fallthrough
CT: control target
= control target key end

     0   :  { %s3236_s0 = inlined_call_operand.vmem [shape: f32[4,8,32], index: 0, kind: input, shape index: {}]   ;;  %s3237_s1 = inlined_call_operand.hbm [shape: f32[4,8,32], index: 1, kind: input, shape index: {}]   ;;  %s3238_s2 = inlined_call_operand.vmem [shape: bf16[32,384], index: 2, kind: input, shape index: {}]   ;;  %s3239_s3 = inlined_call_operand.vmem [shape: bf16[128,32], index: 3, kind: input, shape index: {}]   ;;  %s3240_s4 = inlined_call_operand.vmem [shape: bf16[32,128], index: 4, kind: input, shape index: {}]   ;;  %s3241_s5 = inlined_call_operand.hbm [shape: bf16[32,256], index: 5, kind: input, shape index: {}]   ;;  %s3242_s6 = inlined_call_operand.vmem [shape: bf16[128,32], index: 6, kind: input, shape index: {}]   ;;  %s3243_s7 = inlined_call_operand.hbm [shape: bf16[32,32], index: 7, kind: input, shape index: {}]   ;;  %s3244_s8 = inlined_call_operand.vmem [shape: f32[11,384], index: 8, kind: input, shape index: {}]   ;;  %s3245_s9 = inlined_call_operand.hbm [shape: f32[4,8,32], index: 9, kind: output, shape index: {}]  }
   0x1   :  { %3249 = sst [smem:[#allocation13_spill]] %s3241_s5 }
   0x2   :  { %3250 = sst [smem:[#allocation14_spill]] %s3243_s7 }
   0x3   :  { %14 = vsyncpa [#allocation3], 0 }
   0x4   :  { %16 = vsyncpa [#allocation3 + $0x1], 0 }
   0x5   :  { %17 = vsyncpa [#allocation6], 0 }
   0x6   :  { %18 = vsyncpa [#allocation4], 0 }
   0x7   :  { %20 = vsyncpa [#allocation4 + $0x1], 0  ;;  %s2675_s30 = smov 0   ;;  %s2677_s10 = smov 0  }
   0x8   :  { %s2679_s11 = smov 0   ;;  %s2681_s12 = smov 0  }
   0x9 LB: > { %s2696_s13 = sadd.s32 4294967295, %s2611_s12   ;;  %s2054_s14 = sadd.s32 4294967294, %s2611_s12   ;;  %s2611_s12 = sphi %s2681_s12, %s3267_s12   ;;  %s2607_s11 = sphi %s2679_s11, %s3266_s11   ;;  %s2603_s10 = sphi %s2677_s10, %s3265_s10   ;;  %s2599_s30 = sphi %s2675_s30, %s3264_s30  }
   0xa   : > { %p72_p0 = scmp.ne.s32.totalorder %s2603_s10, %s2599_s30  ;;  %p73_p1 = scmp.eq.s32.totalorder %s2696_s13, 0 }
   0xb   : > { %p243_p2 = scmp.eq.s32.totalorder %s2696_s13, 1  ;;  %p249_p3 = scmp.eq.s32.totalorder %s2054_s14, 1 }
   0xc   : > { %p2705_p4 = por %p73_p1, %p72_p0  ;;  %p2055_p5 = scmp.ge.s32.totalorder %s2611_s12, 1 }
   0xd   : > { %p2710_p6 = por %p249_p3, %p72_p0  ;;  %p256_p7 = scmp.lt.s32.totalorder %s2611_s12, 3 }
   0xe   : > { %s3253_s5 = sld [smem:[#allocation13_spill]]  ;;  %s2613_s21 = smov [#allocation5]  }
   0xf   : > { %p2718_p8 = pnand %p2055_p5, %p256_p7  ;;  %s278_s22 = sshll.u32 %s2613_s21, 4  ;;  %s279_s22 = int_to_ptr.vmem [resolvable:$true] %s278_s22 }
  0x10   : > { %s3255_s7 = sld [smem:[#allocation14_spill]]  ;;  %s3246_s26 = smov 128  }
  0x11   : > { %p2277_p9 = pneg %p2718_p8  ;;  %s3247_s27 = smov 8  }
  0x12   : > { %s2616_s28 = smov [#allocation7]   ;;  %s2617_s14 = smov 64  }
  0x13   : > { %p2278_p10 = pnand %p2277_p9, %p73_p1  ;;  %s295_s29 = sshll.u32 %s2616_s28, 4  ;;  %s296_s29 = int_to_ptr.vmem [resolvable:$true] %s295_s29 }
  0x14   : > { %s276_s19 = sshll.u32 %s3253_s5, 4  ;;  %s2618_s17 = smov 4   ;;  %s277_s19 = int_to_ptr.hbm [resolvable:$true] %s276_s19 }
  0x15   : > { %2280 = dma.hbm_to_vmem [thread:$0]  (!%p2278_p10), %s277_s19, 512, %s279_s22, [#allocation6], %s3246_s26, %s3246_s26, %s3247_s27  }
  0x16   : > { %s293_s25 = sshll.u32 %s3255_s7, 4  ;;  %s2734_s18 = sadd.s32 1, %s2611_s12   ;;  %s294_s25 = int_to_ptr.hbm [resolvable:$true] %s293_s25 }
  0x17   : > { %2283 = dma.hbm_to_vmem [thread:$0]  (!%p2278_p10), %s294_s25, 256, %s296_s29, [#allocation6], %s2617_s14, %s2617_s14, %s2618_s17  }
  0x18   : > { %s56_s21 = ssub.s32 %s2611_s12, %s2734_s18  ;;  %s59_s23 = sadd.s32 1, %s2607_s11 }
  0x19   : > { %p57_p12 = scmp.eq.s32.totalorder %s56_s21, 0  ;;  %p66_p13 = scmp.ne.s32.totalorder %s2607_s11, %s2603_s10 }
  0x1a   : > { %p67_p0 = scmp.eq.s32.totalorder %s2611_s12, 0  ;;  %p2294_p7 = scmp.lt.s32.totalorder %s2611_s12, 2 }
  0x1b   : > { %s2743_s24 = scalar_select %p57_p12, %s2607_s11, %s59_s23  }
  0x1c   : > { %p68_p3 = por %p67_p0, %p66_p13  ;;  %p2747_p5 = por %p243_p2, %p66_p13 }
  0x1d   : > { %3256 = sst [smem:[#allocation12_spill]] %s2743_s24  ;;  %s321_s22 = sand.u32 1, %s2607_s11  }
  0x1e   : > { %s2059_s28 = sshll.u32 %s321_s22, 4  ;;  %s2233_s25 = sshll.u32 %s2611_s12, 4 }
  0x1f   : > { %s330_s17 = scalar_lea.hbm %s3237_s1, %s2233_s25  ;;  %s325_s21 = scalar_lea.vmem [#allocation2], %s2059_s28 }
  0x20   : > { %s333_s26 = sshll.u32 %s325_s21, 4  ;;  %s331_s27 = sshll.u32 %s330_s17, 4  ;;  %s334_s26 = int_to_ptr.vmem [resolvable:$true] %s333_s26  ;;  %s332_s27 = int_to_ptr.hbm [resolvable:$true] %s331_s27 }
  0x21   : > { %p2757_p9 = pnand %p2294_p7, %p68_p3  ;;  %s322_s5 = scalar_lea.sflag [#allocation3], %s321_s22 }
  0x22   : > { %s2511_s7 = sshra.s32 %s332_s27, 4  ;;  %s2518_s29 = scalar_lea.hbm %s3237_s1, 32  ;;  %s2512_s7 = int_to_ptr.hbm [resolvable:$true] %s2511_s7 }
  0x23   : > { %s2513_s24 = scalar_lea.hbm %s2512_s7, 16  ;;  %p2515_p10 = pneg %p2757_p9 }
  0x24   : > { %p2514_p2 = scmp.ne.s32.totalorder %s2512_s7, %s2513_s24  ;;  %p2519_p0 = scmp.lt.s32.totalorder %s2512_s7, %s3237_s1 }
  0x25   : > { %p2520_p3 = scmp.lt.s32.totalorder %s2518_s29, %s2513_s24 }
  0x26   : > { %p2516_p12 = pnand %p2515_p10, %p2514_p2 }
  0x27   : > { %p2521_p7 = por %p2520_p3, %p2519_p0 }
  0x28   : > { %p2517_p13 = pneg %p2516_p12 }
  0x2a   : > { %p2522_p11 = pnand %p2521_p7, %p2517_p13 }
  0x2c   : > { %2525 = shalt.err (!%p2522_p11)
}
  0x2d   : > { %s3259_s22 = smov 8   ;;  %s3260_s21 = smov 128  }
  0x2e   : > { %2287 = dma.hbm_to_vmem [thread:$0]  (!%p2757_p9), %s332_s27, 256, %s334_s26, %s322_s5, %s3260_s21, %s3260_s21, %s3259_s22  }
  0x2f   : > { %345 = sbr.rel (%p2718_p8) target bundleno = 2902 (0xb56), region = 56  ;;  %s2777_s25 = sand.u32 (!%p2718_p8), 1, %s2603_s10  }
  0x30   : > { %s3248_s7 = sshll.u32 (!%p2718_p8), %s2777_s25, 4  ;;  %s348_s24 = scalar_lea.sflag (!%p2718_p8), [#allocation3], %s2777_s25 }
  0x31   : > { %s2783_s28 = scalar_lea.vmem (!%p2718_p8), [#allocation2], %s3248_s7 }
  0x34   : > { %2586 = dma.done.wait (%p2705_p4), %s348_s24, 256  }
  0x35   : > { %2588 = vsyncadd (%p2705_p4), %s348_s24, 4294967040 }
  0x36   : > { %2590 = dma.done.wait (%p73_p1), [#allocation6], 768  }
  0x37   : > { %2592 = vsyncadd (%p73_p1), [#allocation6], 4294966528  ;;  %s2067_s5 = sshll.u32 %s2696_s13, 1  ;;  %v2083_v0 = vld [vmem:[%s3238_s2 + $0x18] sm:$0xf]  ;;  %vm464_vm0 = vcmask 261120  }
  0x38   : > { %p403_p8 = scmp.lt.s32.totalorder %s2067_s5, 3  ;;  %v2238_v1 = vld [vmem:[%s3238_s2 + $0x20] sm:$0xf0]  ;;  %v2237_v2 = vld [vmem:[%s3238_s2 + $0x1c] sm:$0xf]  ;;  %v2832_v15 = vld [vmem:[%s3244_s8 + $0x8] sm:$0xff] }
  0x39   : > { %v2084_v3 = vor.u32 %v2238_v1, %v2083_v0  ;;  %v2085_v4 = vld [vmem:[%s3238_s2 + $0x24] sm:$0xf0]  ;;  %v2071_v5 = vld [vmem:[%s3238_s2] sm:$0xf]  ;;  %v2235_v6 = vld [vmem:[%s3238_s2 + $0x8] sm:$0xf0] }
  0x3a   : > { %s3269_s5 = smov (!%p403_p8, %s2067_s5), 3  ;;  %v2088_v7 = vor.u32 %v2237_v2, %v2085_v4  ;;  %v2234_v8 = vld [vmem:[%s3238_s2 + $0x4] sm:$0xf]  ;;  %v2073_v9 = vld [vmem:[%s3238_s2 + $0xc] sm:$0xf0]  ;;  %v2072_v10 = vor.u32 %v2235_v6, %v2071_v5  ;;  %v430_v16 = vperm.slane %v2832_v15, 0 }
  0x3b   : > { %s2068_s20 = sshll.u32 %s3269_s5, 3  ;;  %474 = vmatpush.bf16.msra.mxu2 %v2084_v3  ;;  %v2076_v13 = vor.u32 %v2234_v8, %v2073_v9  ;;  %v2838_v17 = vld [vmem:[%s3244_s8] sm:$0xff]  ;;  %s2619_s24 = smov 64   ;;  %v2239_v35 = vld [vmem:[%s3238_s2 + $0x28] sm:$0xf0]  ;;  %vm548_vm1 = vcmask 64512  }
  0x3c   : > { %s406_s21 = scalar_lea.vmem %s3236_s0, %s2068_s20  ;;  %488 = vmatpush.bf16.msra.mxu1 %v2088_v7  ;;  %v429_v20 = vperm.slane %v2838_v17, 0  ;;  %s2620_s5 = smov 96   ;;  %v2091_v34 = vld [vmem:[%s3238_s2 + $0x20] sm:$0xf]  ;;  %v2079_v42 = vld [vmem:[%s3238_s2 + $0x8] sm:$0xf] }
  0x3d   : > { %v2821_v11 = vld [vmem:[%s406_s21] sm:$0xff]  ;;  %v2823_v12 = vld [vmem:[%s406_s21 + $0x8] sm:$0xff]  ;;  %s2621_s26 = smov 32   ;;  %v2092_v36 = vor.u32 %v2239_v35, %v2091_v34  ;;  %v2236_v43 = vld [vmem:[%s3238_s2 + $0x10] sm:$0xf0]  ;;  %vm564_vm2 = vcmask 1043456  }
  0x3e   : > { %v420_v14 = vpack.c.bf16 %v2823_v12, %v2821_v11  ;;  %v2080_v44 = vor.u32 %v2236_v43, %v2079_v42  ;;  %v2887_v62 = vld [vmem:[%s3244_s8 + $0x10] sm:$0xff]  ;;  %vm765_vm3 = vcmask 523264   ;;  %vm767_vm4 = vcmask 785408   ;;  %s1935_s22 = scalar_lea.sflag [#allocation4], %s2777_s25 }
  0x3f   : > { %475 = vmatpush.bf16.msra.mxu2 %v2072_v10  ;;  %v431_v1 = vperm.slane %v2887_v62, 0 }
  0x40   : > { %489 = vmatpush.bf16.msra.mxu1 %v2076_v13 }
  0x42   : > { %2093 = vmatmul.msk.bf16.vlgmr.msra.gmra.mxu2 %vm464_vm0, %v420_v14 }
  0x43   : > { %2094 = vmatmul.msk.bf16.vlgmr.msra.gmra.mxu1 %vm464_vm0, %v420_v14  ;;  %502 = vmatpush.bf16.msrb.mxu2 %v2092_v36 }
  0x47   : > { %503 = vmatpush.bf16.msrb.mxu2 %v2080_v44 }
  0x52   : > { %2095 = vmatmul.msk.bf16.vlgmr.msrb.gmra.mxu2 %vm464_vm0, %v420_v14 }
  0xc0   : > { %v491_v18 = vpop.f32.mrf.mxu1 }
  0xc1   : > { %v492_v19 = vadd.f32 %v491_v18, %v430_v16 }
  0xc3   : > { %v527_v21 = vpack.c.bf16 %v492_v19, %v492_v19 }
  0xc5   : > { %642 = vrot.lane.b32.xlu1 %v527_v21, %s2619_s24  ;;  %585 = vrot.lane.b32.xlu0 %v527_v21, %s2620_s5  ;;  %v477_v22 = vpop.f32.mrf.mxu2  ;;  %v533_v23 = vsel %vm464_vm0, %v527_v21, 0 }
  0xc6   : > { %v478_v24 = vadd.f32 %v477_v22, %v429_v20  ;;  %542 = vmatpush.bf16.xpose.msra.mxu3 %v533_v23 }
  0xc8   : > { %v526_v25 = vpack.c.bf16 %v478_v24, %v478_v24  ;;  %v493_v26 = vpop.f32.mrf.mxu1 }
  0xc9   : > { %v494_v28 = vadd.f32 %v493_v26, %v430_v16 }
  0xca   : > { %640 = vrot.lane.b32.xlu2 %v526_v25, %s2619_s24 }
  0xcb   : > { %v770_v30 = vpack.c.bf16 %v494_v28, %v494_v28 }
  0xcd   : > { %698 = vrot.lane.b32.xlu1 %v527_v21, %s2621_s26  ;;  %582 = vrot.lane.b32.xlu0 %v526_v25, %s2620_s5  ;;  %v479_v27 = vpop.f32.mrf.mxu2  ;;  %v776_v41 = vsel %vm464_vm0, %v770_v30, 0 }
  0xce   : > { %2096 = vmatmul.msk.bf16.vlgmr.msra.gmra.mxu3 %vm464_vm0, %v526_v25  ;;  %v480_v29 = vadd.f32 %v479_v27, %v429_v20 }
  0xd0   : > { %v769_v31 = vpack.c.bf16 %v480_v29, %v480_v29 }
  0xd2   : > { %696 = vrot.lane.b32.xlu2 %v526_v25, %s2621_s26 }
  0xd5   : > { %823 = vrot.lane.b32.xlu1 %v769_v31, %s2620_s5  ;;  %826 = vrot.lane.b32.xlu0 %v770_v30, %s2620_s5  ;;  %v505_v5 = vpop.f32.mrf.mxu2 }
  0xd6   : > { %v506_v6 = vadd.f32 %v505_v5, %v431_v1 }
  0xd8   : > { %v528_v9 = vpack.c.bf16 %v506_v6, %v506_v6 }
  0xda   : > { %883 = vrot.lane.b32.xlu2 %v770_v30, %s2619_s24  ;;  %v566_v14 = vsel %vm564_vm2, %v528_v9, 0 }
  0xdb   : > { %575 = vmatpush.bf16.msra.mxu0 %v566_v14 }
  0xdd   : > { %881 = vrot.lane.b32.xlu1 %v769_v31, %s2619_s24  ;;  %939 = vrot.lane.b32.xlu0 %v770_v30, %s2621_s26 }
  0xe2   : > { %937 = vrot.lane.b32.xlu2 %v769_v31, %s2621_s26 }
 0x124   : > { %v641_v32 = vpop.permute.xlu2 %640 }
 0x12c   : > { %v697_v33 = vpop.permute.xlu2 %696 }
 0x134   : > { %v884_v45 = vpop.permute.xlu2 %883 }
 0x135   : > { %v889_v48 = vsel %vm464_vm0, %v884_v45, 0 }
 0x137   : > { %v643_v37 = vpop.permute.xlu1 %642  ;;  %v586_v38 = vpop.permute.xlu0 %585 }
 0x138   : > { %v591_v39 = vsel %vm464_vm0, %v586_v38, 0  ;;  %v648_v40 = vsel %vm464_vm0, %v643_v37, 0 }
 0x139   : > { %600 = vmatpush.bf16.xpose.msrb.mxu1 %v591_v39  ;;  %657 = vmatpush.bf16.xpose.msrb.mxu3 %v648_v40 }
 0x13c   : > { %v938_v59 = vpop.permute.xlu2 %937 }
 0x13f   : > { %v699_v46 = vpop.permute.xlu1 %698  ;;  %v583_v47 = vpop.permute.xlu0 %582 }
 0x140   : > { %v704_v49 = vsel %vm464_vm0, %v699_v46, 0  ;;  %2098 = vmatmul.msk.bf16.vlgmr.msrb.gmra.mxu1 %vm464_vm0, %v583_v47  ;;  %2100 = vmatmul.msk.bf16.vlgmr.msrb.gmra.mxu3 %vm464_vm0, %v641_v32 }
 0x141   : > { %785 = vmatpush.bf16.xpose.msra.mxu3 %v776_v41  ;;  %713 = vmatpush.bf16.xpose.msra.mxu1 %v704_v49 }
 0x147   : > { %v827_v50 = vpop.permute.xlu0 %826  ;;  %v824_v56 = vpop.permute.xlu1 %823 }
 0x148   : > { %v832_v51 = vsel %vm464_vm0, %v827_v50, 0 }
 0x149   : > { %898 = vmatpush.bf16.xpose.msrb.mxu3 %v889_v48  ;;  %841 = vmatpush.bf16.xpose.msrb.mxu1 %v832_v51  ;;  %v507_v48 = vpop.f32.mrf.mxu2 }
 0x14a   : > { %v508_v51 = vadd.f32 %v507_v48, %v431_v1 }
 0x14f   : > { %v940_v52 = vpop.permute.xlu0 %939  ;;  %v882_v58 = vpop.permute.xlu1 %881 }
 0x150   : > { %v945_v53 = vsel %vm464_vm0, %v940_v52, 0  ;;  %2102 = vmatmul.msk.bf16.vlgmr.msra.gmra.mxu1 %vm464_vm0, %v697_v33  ;;  %2104 = vmatmul.msk.bf16.vlgmr.msra.gmra.mxu3 %vm464_vm0, %v769_v31 }
 0x151   : > { %v544_v54 = vpop.f32.mrf.mxu3  ;;  %954 = vmatpush.bf16.xpose.msra.mxu1 %v945_v53 }
 0x152   : > { %v549_v55 = vsel %vm548_vm1, %v544_v54, -inf }
 0x153   : > { %550 = vmax.xlane.f32.xlu1 %v549_v55 }
 0x159   : > { %v546_v57 = vpop.f32.mrf.mxu3 }
 0x160   : > { %2106 = vmatmul.msk.bf16.vlgmr.msrb.gmra.mxu1 %vm464_vm0, %v824_v56  ;;  %2108 = vmatmul.msk.bf16.vlgmr.msrb.gmra.mxu3 %vm464_vm0, %v882_v58 }
 0x170   : > { %2110 = vmatmul.msk.bf16.vlgmr.msra.gmra.mxu1 %vm464_vm0, %v938_v59 }
 0x1bd   : > { %v602_v60 = vpop.f32.mrf.mxu1 }
 0x1be   : > { %v606_v61 = vsel %vm548_vm1, %v602_v60, -inf }
 0x1bf   : > { %607 = vmax.xlane.f32.xlu0 %v606_v61 }
 0x1c3   : > { %v659_v63 = vpop.f32.mrf.mxu3 }
 0x1c4   : > { %v663_v0 = vsel %vm548_vm1, %v659_v63, -inf }
 0x1c5   : > { %v604_v2 = vpop.f32.mrf.mxu1  ;;  %664 = vmax.xlane.f32.xlu2 %v663_v0 }
 0x1c6   : > { %v551_v3 = vpop.xlane.xlu1 %550 }
 0x1c7   : > { %v552_v4 = vsub.f32 %v544_v54, %v551_v3  ;;  %v771_v54 = vpack.c.bf16 %v508_v51, %v508_v51 }
 0x1c9   : > { %v553_v7 = vmul.f32 1.442695, %v552_v4  ;;  %v807_v0 = vsel %vm564_vm2, %v771_v54, 0 }
 0x1cb   : > { %v661_v8 = vpop.f32.mrf.mxu3  ;;  %2372 = vpow2.f32 %v553_v7 }
 0x1cd   : > { %v715_v10 = vpop.f32.mrf.mxu1 }
 0x1ce   : > { %v719_v13 = vsel %vm548_vm1, %v715_v10, -inf }
 0x1cf   : > { %720 = vmax.xlane.f32.xlu2 %v719_v13 }
 0x1d1   : > { %v2373_v16 = vpop.eup %2372 }
 0x1d2   : > { %v555_v21 = vsel %vm548_vm1, %v2373_v16, 0.0 }
 0x1d3   : > { %v787_v18 = vpop.f32.mrf.mxu3 }
 0x1d4   : > { %v791_v19 = vsel %vm548_vm1, %v787_v18, -inf }
 0x1d5   : > { %v717_v20 = vpop.f32.mrf.mxu1  ;;  %792 = vmax.xlane.f32.xlu1 %v791_v19 }
 0x1d7   : > { %556 = vadd.xlane.f32.xlu2 %v555_v21 }
 0x1db   : > { %v789_v22 = vpop.f32.mrf.mxu3 }
 0x1dd   : > { %v843_v23 = vpop.f32.mrf.mxu1 }
 0x1de   : > { %v847_v24 = vsel %vm548_vm1, %v843_v23, -inf }
 0x1df   : > { %848 = vmax.xlane.f32.xlu0 %v847_v24 }
 0x1e3   : > { %v900_v25 = vpop.f32.mrf.mxu3 }
 0x1e4   : > { %v904_v26 = vsel %vm548_vm1, %v900_v25, -inf }
 0x1e5   : > { %v845_v27 = vpop.f32.mrf.mxu1  ;;  %905 = vmax.xlane.f32.xlu1 %v904_v26 }
 0x1eb   : > { %v902_v28 = vpop.f32.mrf.mxu3 }
 0x1ed   : > { %v2899_v29 = vpop.f32.mrf.mxu1 }
 0x1ee   : > { %v960_v31 = vsel %vm548_vm1, %v2899_v29, -inf }
 0x1ef   : > { %675 = vrot.lane.b32.xlu2 %v528_v9, %s2619_s24 }
 0x1f3   : > { %619 = vrot.lane.b32.xlu0 %v528_v9, %s2620_s5 }
 0x1f5   : > { %v958_v30 = vpop.f32.mrf.mxu1 }
 0x1fe   : > { %731 = vrot.lane.b32.xlu1 %v528_v9, %s2621_s26 }
 0x218   : > { %961 = vmax.xlane.f32.xlu2 %v960_v31 }
 0x232   : > { %v608_v32 = vpop.xlane.xlu0 %607 }
 0x233   : > { %v609_v33 = vsub.f32 %v602_v60, %v608_v32 }
 0x235   : > { %v610_v34 = vmul.f32 1.442695, %v609_v33 }
 0x237   : > { %2374 = vpow2.f32 %v610_v34 }
 0x238   : > { %v665_v35 = vpop.xlane.xlu2 %664 }
 0x239   : > { %v666_v36 = vsub.f32 %v659_v63, %v665_v35 }
 0x23b   : > { %v667_v37 = vmul.f32 1.442695, %v666_v36 }
 0x23d   : > { %v2906_v38 = vpop.eup %2374  ;;  %2376 = vpow2.f32 %v667_v37 }
 0x23e   : > { %v612_v39 = vsel %vm548_vm1, %v2906_v38, 0.0 }
 0x23f   : > { %613 = vadd.xlane.f32.xlu0 %v612_v39 }
 0x242   : > { %v721_v40 = vpop.xlane.xlu2 %720 }
 0x243   : > { %v2910_v41 = vpop.eup %2376  ;;  %v722_v42 = vsub.f32 %v715_v10, %v721_v40 }
 0x244   : > { %v669_v43 = vsel %vm548_vm1, %v2910_v41, 0.0 }
 0x245   : > { %v723_v44 = vmul.f32 1.442695, %v722_v42  ;;  %670 = vadd.xlane.f32.xlu2 %v669_v43 }
 0x247   : > { %2378 = vpow2.f32 %v723_v44 }
 0x248   : > { %v793_v45 = vpop.xlane.xlu1 %792 }
 0x249   : > { %v794_v46 = vsub.f32 %v787_v18, %v793_v45 }
 0x24a   : > { %v557_v47 = vpop.xlane.xlu2 %556 }
 0x24b   : > { %v795_v49 = vmul.f32 1.442695, %v794_v46  ;;  %2380 = vrcp.f32 %v557_v47 }
 0x24d   : > { %v2914_v50 = vpop.eup %2378  ;;  %2382 = vpow2.f32 %v795_v49 }
 0x24e   : > { %v725_v52 = vsel %vm548_vm1, %v2914_v50, 0.0 }
 0x24f   : > { %726 = vadd.xlane.f32.xlu1 %v725_v52 }
 0x251   : > { %v2381_v53 = vpop.eup %2380 }
 0x252   : > { %v849_v55 = vpop.xlane.xlu0 %848  ;;  %v676_v56 = vpop.permute.xlu2 %675  ;;  %v559_v57 = vmul.f32 %v2381_v53, %v2373_v16 }
 0x253   : > { %v2383_v58 = vpop.eup %2382  ;;  %v850_v59 = vsub.f32 %v843_v23, %v849_v55  ;;  %v681_v60 = vsel %vm564_vm2, %v676_v56, 0 }
 0x254   : > { %690 = vmatpush.bf16.msrb.mxu0 %v681_v60  ;;  %v560_v61 = vpack.c.bf16 %v559_v57, %v559_v57  ;;  %v797_v1 = vsel %vm548_vm1, %v2383_v58, 0.0 }
 0x255   : > { %v851_v63 = vmul.f32 1.442695, %v850_v59 }
 0x256   : > { %2097 = vmatmul.msk.bf16.vlgmr.msra.gmra.mxu0 %vm548_vm1, %v560_v61 }
 0x257   : > { %2384 = vpow2.f32 %v851_v63  ;;  %798 = vadd.xlane.f32.xlu1 %v797_v1 }
 0x258   : > { %816 = vmatpush.bf16.msra.mxu0 %v807_v0  ;;  %v906_v2 = vpop.xlane.xlu1 %905 }
 0x259   : > { %v907_v3 = vsub.f32 %v900_v25, %v906_v2 }
 0x25b   : > { %v908_v4 = vmul.f32 1.442695, %v907_v3 }
 0x25d   : > { %v2385_v5 = vpop.eup %2384  ;;  %2386 = vpow2.f32 %v908_v4  ;;  %860 = vrot.lane.b32.xlu2 %v771_v54, %s2620_s5 }
 0x25e   : > { %v853_v6 = vsel %vm548_vm1, %v2385_v5, 0.0 }
 0x25f   : > { %854 = vadd.xlane.f32.xlu0 %v853_v6 }
 0x263   : > { %v2387_v7 = vpop.eup %2386 }
 0x264   : > { %v910_v10 = vsel %vm548_vm1, %v2387_v7, 0.0 }
 0x265   : > { %v620_v8 = vpop.permute.xlu0 %619 }
 0x266   : > { %v625_v9 = vsel %vm564_vm2, %v620_v8, 0 }
 0x267   : > { %634 = vmatpush.bf16.msra.mxu2 %v625_v9  ;;  %911 = vadd.xlane.f32.xlu0 %v910_v10 }
 0x270   : > { %916 = vrot.lane.b32.xlu1 %v771_v54, %s2619_s24  ;;  %v732_v13 = vpop.permute.xlu1 %731 }
 0x271   : > { %v737_v14 = vsel %vm564_vm2, %v732_v13, 0 }
 0x272   : > { %746 = vmatpush.bf16.msrb.mxu2 %v737_v14  ;;  %v2247_v14 = vld [vmem:[%s3239_s3 + $0x38] sm:$0xff] }
 0x273   : > { %1058 = vmatpush.bf16.msra.mxu3 %v2247_v14 }
 0x27b   : > { %972 = vrot.lane.b32.xlu0 %v771_v54, %s2621_s26 }
 0x28b   : > { %v962_v16 = vpop.xlane.xlu2 %961 }
 0x28c   : > { %v963_v18 = vsub.f32 %v2899_v29, %v962_v16  ;;  %v2246_v16 = vld [vmem:[%s3239_s3 + $0x30] sm:$0xff] }
 0x28d   : > { %1059 = vmatpush.bf16.msra.mxu3 %v2246_v16 }
 0x28e   : > { %v964_v19 = vmul.f32 1.442695, %v963_v18  ;;  %v2245_v18 = vld [vmem:[%s3239_s3 + $0x28] sm:$0xff] }
 0x290   : > { %2388 = vpow2.f32 %v964_v19  ;;  %v2244_v19 = vld [vmem:[%s3239_s3 + $0x20] sm:$0xff] }
 0x291   : > { %1060 = vmatpush.bf16.msra.mxu3 %v2245_v18 }
 0x295   : > { %1061 = vmatpush.bf16.msra.mxu3 %v2244_v19 }
 0x296   : > { %v2389_v20 = vpop.eup %2388 }
 0x297   : > { %v966_v21 = vsel %vm548_vm1, %v2389_v20, 0.0 }
 0x298   : > { %967 = vadd.xlane.f32.xlu2 %v966_v21  ;;  %v2242_v21 = vld [vmem:[%s3239_s3 + $0x10] sm:$0xff] }
 0x2b2   : > { %v614_v22 = vpop.xlane.xlu0 %613 }
 0x2b3   : > { %2390 = vrcp.f32 %v614_v22  ;;  %v2241_v22 = vld [vmem:[%s3239_s3 + $0x8] sm:$0xff] }
 0x2b8   : > { %v671_v23 = vpop.xlane.xlu2 %670 }
 0x2b9   : > { %v2391_v24 = vpop.eup %2390  ;;  %2392 = vrcp.f32 %v671_v23  ;;  %v2240_v23 = vld [vmem:[%s3239_s3] sm:$0xff] }
 0x2ba   : > { %v616_v25 = vmul.f32 %v2391_v24, %v2906_v38 }
 0x2bc   : > { %v617_v26 = vpack.c.bf16 %v616_v25, %v616_v25 }
 0x2be   : > { %2099 = vmatmul.msk.bf16.vlgmr.msra.gmra.mxu2 %vm548_vm1, %v617_v26 }
 0x2bf   : > { %v2393_v27 = vpop.eup %2392 }
 0x2c0   : > { %v673_v28 = vmul.f32 %v2393_v27, %v2910_v41  ;;  %v861_v29 = vpop.permute.xlu2 %860 }
 0x2c1   : > { %v866_v30 = vsel %vm564_vm2, %v861_v29, 0 }
 0x2c2   : > { %875 = vmatpush.bf16.msra.mxu2 %v866_v30  ;;  %v727_v31 = vpop.xlane.xlu1 %726  ;;  %v674_v32 = vpack.c.bf16 %v673_v28, %v673_v28 }
 0x2c3   : > { %2394 = vrcp.f32 %v727_v31 }
 0x2c4   : > { %2101 = vmatmul.msk.bf16.vlgmr.msrb.gmra.mxu0 %vm548_vm1, %v674_v32 }
 0x2c9   : > { %v2395_v33 = vpop.eup %2394 }
 0x2ca   : > { %v729_v34 = vmul.f32 %v2395_v33, %v2914_v50  ;;  %v799_v35 = vpop.xlane.xlu1 %798 }
 0x2cb   : > { %2396 = vrcp.f32 %v799_v35 }
 0x2cc   : > { %v730_v36 = vpack.c.bf16 %v729_v34, %v729_v34 }
 0x2ce   : > { %2103 = vmatmul.msk.bf16.vlgmr.msrb.gmra.mxu2 %vm548_vm1, %v730_v36 }
 0x2d1   : > { %v2397_v37 = vpop.eup %2396 }
 0x2d2   : > { %v801_v38 = vmul.f32 %v2397_v37, %v2383_v58  ;;  %v855_v39 = vpop.xlane.xlu0 %854 }
 0x2d3   : > { %2398 = vrcp.f32 %v855_v39  ;;  %v2940_v40 = vpop.f32.mrf.mxu0 }
 0x2d4   : > { %v802_v41 = vpack.c.bf16 %v801_v38, %v801_v38 }
 0x2d6   : > { %2105 = vmatmul.msk.bf16.vlgmr.msra.gmra.mxu0 %vm548_vm1, %v802_v41  ;;  %v1009_v41 = vperm.slane %v2838_v17, 2 }
 0x2d9   : > { %v2399_v42 = vpop.eup %2398 }
 0x2da   : > { %v857_v43 = vmul.f32 %v2399_v42, %v2385_v5  ;;  %v912_v44 = vpop.xlane.xlu0 %911 }
 0x2db   : > { %2400 = vrcp.f32 %v912_v44  ;;  %v579_v45 = vpop.f32.mrf.mxu0 }
 0x2dc   : > { %v858_v46 = vpack.c.bf16 %v857_v43, %v857_v43 }
 0x2de   : > { %2107 = vmatmul.msk.bf16.vlgmr.msra.gmra.mxu2 %vm548_vm1, %v858_v46 }
 0x2e1   : > { %v2401_v47 = vpop.eup %2400 }
 0x2e2   : > { %v914_v48 = vmul.f32 %v2401_v47, %v2387_v7  ;;  %v917_v49 = vpop.permute.xlu1 %916 }
 0x2e3   : > { %v922_v50 = vsel %vm564_vm2, %v917_v49, 0 }
 0x2e4   : > { %v915_v51 = vpack.c.bf16 %v914_v48, %v914_v48  ;;  %931 = vmatpush.bf16.msrb.mxu0 %v922_v50 }
 0x2e7   : > { %2109 = vmatmul.msk.bf16.vlgmr.msrb.gmra.mxu0 %vm548_vm1, %v915_v51 }
 0x2ed   : > { %v973_v52 = vpop.permute.xlu0 %972 }
 0x2ee   : > { %v978_v53 = vsel %vm564_vm2, %v973_v52, 0  ;;  %v2163_v52 = vld [vmem:[#allocation5 + $0x10] sm:$0xf] }
 0x2ef   : > { %987 = vmatpush.bf16.msrb.mxu2 %v978_v53  ;;  %v2253_v53 = vld [vmem:[#allocation5 + $0x14] sm:$0xf0] }
 0x30b   : > { %v968_v54 = vpop.xlane.xlu2 %967 }
 0x30c   : > { %2402 = vrcp.f32 %v968_v54  ;;  %v2164_v54 = vor.u32 %v2253_v53, %v2163_v52  ;;  %v1140_v53 = vperm.slane %v2838_v17, 1 }
 0x30e   : > { %1205 = vmatpush.bf16.msrb.mxu1 %v2164_v54  ;;  %v2252_v54 = vld [vmem:[#allocation5 + $0x14] sm:$0xf] }
 0x312   : > { %v2403_v55 = vpop.eup %2402 }
 0x313   : > { %v970_v56 = vmul.f32 %v2403_v55, %v2389_v20  ;;  %v2243_v20 = vld [vmem:[%s3239_s3 + $0x18] sm:$0xff]  ;;  %v2622_v55 = vmov 32.0  }
 0x314   : > { %1062 = vmatpush.bf16.msra.mxu3 %v2243_v20  ;;  %2404 = vrcp.f32 %v2622_v55  ;;  %v2165_v55 = vld [vmem:[#allocation5 + $0x18] sm:$0xf0] }
 0x315   : > { %v971_v57 = vpack.c.bf16 %v970_v56, %v970_v56  ;;  %v2251_v56 = vld [vmem:[#allocation5 + $0x4] sm:$0xf0] }
 0x317   : > { %2111 = vmatmul.msk.bf16.vlgmr.msrb.gmra.mxu2 %vm548_vm1, %v971_v57 }
 0x318   : > { %1063 = vmatpush.bf16.msra.mxu3 %v2242_v21 }
 0x31c   : > { %1064 = vmatpush.bf16.msra.mxu3 %v2241_v22 }
 0x320   : > { %1065 = vmatpush.bf16.msra.mxu3 %v2240_v23 }
 0x341   : > { %v636_v58 = vpop.f32.mrf.mxu2  ;;  %v692_v59 = vpop.f32.mrf.mxu0 }
 0x349   : > { %v638_v60 = vpop.f32.mrf.mxu2  ;;  %v694_v61 = vpop.f32.mrf.mxu0 }
 0x34a   : > { %v2405_v61 = vpop.eup %2404 }
 0x34b   : > { %vm1085_vm5 = vweird.f32 %v2405_v61 }
 0x351   : > { %v748_v63 = vpop.f32.mrf.mxu2 }
 0x353   : > { %v818_v0 = vpop.f32.mrf.mxu0 }
 0x359   : > { %v750_v1 = vpop.f32.mrf.mxu2 }
 0x35b   : > { %v820_v2 = vpop.f32.mrf.mxu0 }
 0x361   : > { %v877_v3 = vpop.f32.mrf.mxu2 }
 0x362   : > { %v2342_v4 = vpack.i.bf16 %v877_v3, %v636_v58  ;;  %v417_v58 = vld [vmem:[%s2783_s28] sm:$0xff] }
 0x364   : > { %2343 = vrot.lane.b32.xlu2 %v2342_v4, %s2621_s26  ;;  %v933_v5 = vpop.f32.mrf.mxu0 }
 0x365   : > { %v2347_v6 = vpack.i.bf16 %v933_v5, %v692_v59  ;;  %v418_v59 = vld [vmem:[%s2783_s28 + $0x8] sm:$0xff]  ;;  %s3261_s28 = sshll.u32 %s2777_s25, 4 }
 0x366   : > { %v3001_v60 = vpack.c.bf16 %v418_v59, %v417_v58  ;;  %v2157_v58 = vld [vmem:[#allocation5 + $0x8] sm:$0xf0]  ;;  %s401_s7 = scalar_lea.vmem [#allocation8], %s3261_s28 }
 0x367   : > { %2348 = vrot.lane.b32.xlu0 %v2347_v6, %s2619_s24 }
 0x369   : > { %v879_v7 = vpop.f32.mrf.mxu2 }
 0x36c   : > { %v935_v8 = vpop.f32.mrf.mxu0 }
 0x39a   : > { %v989_v9 = vpop.f32.mrf.mxu2 }
 0x39b   : > { %v2352_v10 = vpack.i.bf16 %v989_v9, %v748_v63  ;;  %v1081_v63 = vmul.f32 32.0, %v2405_v61  ;;  %v2249_v9 = vld [vmem:[%s3240_s4 + $0x8] sm:$0xff] }
 0x39c   : > { %1162 = vmatpush.bf16.msra.mxu0 %v2249_v9 }
 0x39d   : > { %2353 = vrot.lane.b32.xlu0 %v2352_v10, %s2620_s5 }
 0x3a2   : > { %v991_v13 = vpop.f32.mrf.mxu2 }
 0x3a3   : > { %v2248_v13 = vld [vmem:[%s3240_s4] sm:$0xff] }
 0x3a4   : > { %1163 = vmatpush.bf16.msra.mxu0 %v2248_v13 }
 0x3be   : > { %v2344_v25 = vpop.permute.xlu2 %2343 }
 0x3bf   : > { %v2346_v26 = vunpack.i.h.bf16 %v2344_v25  ;;  %v2345_v27 = vunpack.i.l.bf16 %v2344_v25 }
 0x3c1   : > { %v764_v31 = vsel %vm464_vm0, %v2940_v40, %v2345_v27  ;;  %v1005_v32 = vsel %vm464_vm0, %v818_v0, %v2346_v26  ;;  %v1082_v0 = vsub.f32 1.0, %v1081_v63 }
 0x3c3   : > { %v1083_v1 = vmul.f32 %v2405_v61, %v1082_v0 }
 0x3c5   : > { %v1084_v2 = vadd.f32 %v2405_v61, %v1083_v1 }
 0x3c7   : > { %v3005_v3 = vsel %vm1085_vm5, %v2405_v61, %v1084_v2 }
 0x3d9   : > { %v2349_v24 = vpop.permute.xlu0 %2348 }
 0x3da   : > { %v2351_v28 = vunpack.i.h.bf16 %v2349_v24  ;;  %v2350_v29 = vunpack.i.l.bf16 %v2349_v24 }
 0x3dc   : > { %v1006_v35 = vsel %vm765_vm3, %v1005_v32, %v2351_v28  ;;  %v766_v36 = vsel %vm765_vm3, %v764_v31, %v2350_v29 }
 0x40f   : > { %v2354_v30 = vpop.permute.xlu0 %2353 }
 0x410   : > { %v2356_v33 = vunpack.i.h.bf16 %v2354_v30  ;;  %v2355_v34 = vunpack.i.l.bf16 %v2354_v30 }
 0x412   : > { %v768_v37 = vsel %vm767_vm4, %v766_v36, %v2355_v34  ;;  %v1007_v38 = vsel %vm767_vm4, %v1006_v35, %v2356_v33 }
 0x413   : > { %v1008_v39 = vpack.c.bf16 %v1007_v38, %v768_v37  ;;  %v1129_v37 = vperm.slane %v2838_v17, 3 }
 0x415   : > { %1066 = vmatmul.bf16.vlgmr.msra.gmra.mxu3 %v1008_v39 }
 0x498   : > { %v1067_v42 = vpop.f32.mrf.mxu3 }
 0x499   : > { %v1068_v43 = vadd.f32 %v1067_v42, %v1009_v41 }
 0x49b   : > { %v2984_v40 = vadd.f32 %v1068_v43, %v2821_v11 }
 0x49d   : > { %v1074_v44 = vsel %vm464_vm0, %v2984_v40, 0.0  ;;  %v1089_v45 = vmul.f32 %v2984_v40, %v2984_v40 }
 0x49e   : > { %1075 = vadd.xlane.f32.xlu1 %v1074_v44 }
 0x49f   : > { %v1091_v46 = vsel %vm464_vm0, %v1089_v45, 0.0  ;;  %v1132_v45 = vperm.slane %v2838_v17, 4 }
 0x4a0   : > { %v1069_v47 = vpop.f32.mrf.mxu3  ;;  %1092 = vadd.xlane.f32.xlu2 %v1091_v46 }
 0x4a1   : > { %v1070_v48 = vadd.f32 %v1069_v47, %v1009_v41 }
 0x4a3   : > { %v2992_v49 = vadd.f32 %v1070_v48, %v2823_v12  ;;  %v2155_v12 = vld [vmem:[#allocation5] sm:$0xf] }
 0x4a4   : > { %v2156_v57 = vor.u32 %v2251_v56, %v2155_v12  ;;  %v2168_v12 = vor.u32 %v2252_v54, %v2165_v55 }
 0x4a5   : > { %v1077_v11 = vsel %vm464_vm0, %v2992_v49, 0.0  ;;  %v1090_v50 = vmul.f32 %v2992_v49, %v2992_v49 }
 0x4a6   : > { %1078 = vadd.xlane.f32.xlu0 %v1077_v11  ;;  %1206 = vmatpush.bf16.msrb.mxu1 %v2156_v57  ;;  %v1174_v11 = vperm.slane %v2832_v15, 1  ;;  %v2250_v57 = vld [vmem:[#allocation5 + $0x4] sm:$0xf] }
 0x4a7   : > { %v1094_v51 = vsel %vm464_vm0, %v1090_v50, 0.0  ;;  %1219 = vmatpush.bf16.msra.mxu2 %v2168_v12  ;;  %v2160_v61 = vor.u32 %v2250_v57, %v2157_v58 }
 0x4a8   : > { %1095 = vadd.xlane.f32.xlu1 %v1094_v51 }
 0x4a9   : > { %2169 = vmatmul.msk.bf16.vlgmr.msrb.gmra.mxu1 %vm464_vm0, %v3001_v60 }
 0x4ab   : > { %1220 = vmatpush.bf16.msra.mxu2 %v2160_v61 }
 0x4ae   : > { %2170 = vmatmul.msk.bf16.vlgmr.msra.gmra.mxu2 %vm464_vm0, %v3001_v60 }
 0x511   : > { %v1076_v4 = vpop.xlane.xlu1 %1075 }
 0x512   : > { %v1087_v5 = vmul.f32 %v3005_v3, %v1076_v4 }
 0x513   : > { %v1093_v6 = vpop.xlane.xlu2 %1092 }
 0x514   : > { %v1099_v7 = vmul.f32 %v1087_v5, %v1087_v5  ;;  %v1097_v8 = vmul.f32 %v1093_v6, %v3005_v3  ;;  %v1103_v35 = vsub.f32 %v2984_v40, %v1087_v5 }
 0x516   : > { %v1101_v10 = vsub.f32 %v1097_v8, %v1099_v7 }
 0x518   : > { %v1105_v14 = vadd.f32 1e-05, %v1101_v10 }
 0x519   : > { %v1079_v16 = vpop.xlane.xlu0 %1078 }
 0x51a   : > { %2406 = vrsqrt.f32 %v1105_v14  ;;  %v1088_v18 = vmul.f32 %v3005_v3, %v1079_v16  ;;  %vm1113_vm7 = vweird.f32 %v1105_v14 }
 0x51b   : > { %v1096_v19 = vpop.xlane.xlu1 %1095 }
 0x51c   : > { %v1100_v20 = vmul.f32 %v1088_v18, %v1088_v18  ;;  %v1098_v21 = vmul.f32 %v1096_v19, %v3005_v3  ;;  %v1104_v41 = vsub.f32 %v2992_v49, %v1088_v18 }
 0x51e   : > { %v1102_v22 = vsub.f32 %v1098_v21, %v1100_v20 }
 0x520   : > { %v2407_v23 = vpop.eup %2406  ;;  %v1106_v24 = vadd.f32 1e-05, %v1102_v22 }
 0x521   : > { %v1108_v25 = vmul.f32 %v2407_v23, %v1105_v14  ;;  %vm1114_vm6 = vweird.f32 %v2407_v23 }
 0x522   : > { %2408 = vrsqrt.f32 %v1106_v24  ;;  %vm1115_vm8 = vmor %vm1113_vm7, %vm1114_vm6  ;;  %vm1123_vm10 = vweird.f32 %v1106_v24 }
 0x523   : > { %v1109_v26 = vmul.f32 %v2407_v23, %v1108_v25  ;;  %v1175_v25 = vperm.slane %v2887_v62, 1 }
 0x525   : > { %v1110_v27 = vmul.f32 0.5, %v1109_v26 }
 0x526   : > { %v1208_v50 = vpop.f32.mrf.mxu1 }
 0x527   : > { %v1111_v28 = vsub.f32 1.5, %v1110_v27  ;;  %v1209_v49 = vadd.f32 %v1208_v50, %v1174_v11 }
 0x528   : > { %v2409_v29 = vpop.eup %2408 }
 0x529   : > { %v1112_v30 = vmul.f32 %v2407_v23, %v1111_v28  ;;  %v1118_v31 = vmul.f32 %v2409_v29, %v1106_v24  ;;  %vm1124_vm9 = vweird.f32 %v2409_v29  ;;  %v1244_v51 = vpack.c.bf16 %v1209_v49, %v1209_v49 }
 0x52a   : > { %vm1125_vm11 = vmor %vm1123_vm10, %vm1124_vm9 }
 0x52b   : > { %v1119_v32 = vmul.f32 %v2409_v29, %v1118_v31  ;;  %v1116_v33 = vsel %vm1115_vm8, %v2407_v23, %v1112_v30  ;;  %1300 = vrot.lane.b32.xlu0 %v1244_v51, %s2620_s5  ;;  %1413 = vrot.lane.b32.xlu2 %v1244_v51, %s2621_s26  ;;  %v1250_v52 = vsel %vm464_vm0, %v1244_v51, 0 }
 0x52c   : > { %v1127_v38 = vmul.f32 %v1116_v33, %v1103_v35  ;;  %1259 = vmatpush.bf16.xpose.msrb.mxu0 %v1250_v52 }
 0x52d   : > { %v1120_v34 = vmul.f32 0.5, %v1119_v32 }
 0x52e   : > { %v1130_v43 = vmul.f32 %v1129_v37, %v1127_v38  ;;  %v1210_v63 = vpop.f32.mrf.mxu1 }
 0x52f   : > { %v1121_v36 = vsub.f32 1.5, %v1120_v34  ;;  %v1211_v17 = vadd.f32 %v1210_v63, %v1174_v11 }
 0x530   : > { %v3021_v47 = vadd.f32 %v1132_v45, %v1130_v43 }
 0x531   : > { %v1122_v39 = vmul.f32 %v2409_v29, %v1121_v36  ;;  %v1483_v2 = vpack.c.bf16 %v1211_v17, %v1211_v17  ;;  %v1222_v27 = vpop.f32.mrf.mxu2 }
 0x532   : > { %v1223_v28 = vadd.f32 %v1222_v27, %v1175_v25 }
 0x533   : > { %v1126_v42 = vsel %vm1125_vm11, %v2409_v29, %v1122_v39  ;;  %v1489_v18 = vsel %vm464_vm0, %v1483_v2, 0 }
 0x534   : > { %v1128_v44 = vmul.f32 %v1126_v42, %v1104_v41  ;;  %v3059_v30 = vpack.c.bf16 %v1223_v28, %v1223_v28 }
 0x536   : > { %v1131_v46 = vmul.f32 %v1129_v37, %v1128_v44  ;;  %v1281_v32 = vsel %vm564_vm2, %v3059_v30, 0 }
 0x537   : > { %1290 = vmatpush.bf16.msra.mxu1 %v1281_v32 }
 0x538   : > { %v3023_v48 = vadd.f32 %v1132_v45, %v1131_v46 }
 0x539   : > { %v3068_v35 = vpop.f32.mrf.mxu2 }
 0x53a   : > { %v1135_v40 = vpack.c.bf16 %v3023_v48, %v3021_v47  ;;  %v1225_v27 = vadd.f32 %v3068_v35, %v1175_v25 }
 0x53c   : > { %2152 = vmatmul.msk.bf16.vlgmr.msra.gmra.mxu0 %vm464_vm0, %v1135_v40  ;;  %v1484_v28 = vpack.c.bf16 %v1225_v27, %v1225_v27 }
 0x585   : > { %v1414_v5 = vpop.permute.xlu2 %1413 }
 0x586   : > { %v1419_v60 = vsel %vm464_vm0, %v1414_v5, 0 }
 0x59d   : > { %v1301_v6 = vpop.permute.xlu0 %1300 }
 0x59e   : > { %v1306_v7 = vsel %vm464_vm0, %v1301_v6, 0 }
 0x59f   : > { %1315 = vmatpush.bf16.xpose.msrb.mxu2 %v1306_v7 }
 0x5a7   : > { %1428 = vmatpush.bf16.xpose.msra.mxu2 %v1419_v60 }
 0x5b9   : > { %v1165_v56 = vpop.f32.mrf.mxu0 }
 0x5ba   : > { %v1166_v59 = vadd.f32 %v1165_v56, %v1140_v53 }
 0x5bc   : > { %v1243_v15 = vpack.c.bf16 %v1166_v59, %v1166_v59 }
 0x5be   : > { %1355 = vrot.lane.b32.xlu2 %v1243_v15, %s2619_s24  ;;  %1411 = vrot.lane.b32.xlu0 %v1243_v15, %s2621_s26 }
 0x5bf   : > { %1297 = vrot.lane.b32.xlu1 %v1243_v15, %s2620_s5  ;;  %2171 = vmatmul.msk.bf16.vlgmr.msrb.gmra.mxu0 %vm464_vm0, %v1243_v15 }
 0x5c1   : > { %v1167_v0 = vpop.f32.mrf.mxu0 }
 0x5c2   : > { %v1168_v1 = vadd.f32 %v1167_v0, %v1140_v53 }
 0x5c4   : > { %v1482_v4 = vpack.c.bf16 %v1168_v1, %v1168_v1 }
 0x5c6   : > { %1650 = vrot.lane.b32.xlu2 %v1482_v4, %s2621_s26  ;;  %1539 = vrot.lane.b32.xlu0 %v1483_v2, %s2620_s5 }
 0x5c7   : > { %1357 = vrot.lane.b32.xlu1 %v1244_v51, %s2619_s24 }
 0x5ce   : > { %1652 = vrot.lane.b32.xlu0 %v1483_v2, %s2621_s26 }
 0x5cf   : > { %1536 = vrot.lane.b32.xlu1 %v1482_v4, %s2620_s5 }
 0x5d6   : > { %1594 = vrot.lane.b32.xlu0 %v1482_v4, %s2619_s24 }
 0x5d7   : > { %1596 = vrot.lane.b32.xlu1 %v1483_v2, %s2619_s24 }
 0x618   : > { %v1356_v22 = vpop.permute.xlu2 %1355 }
 0x620   : > { %v1651_v33 = vpop.permute.xlu2 %1650 }
 0x630   : > { %v1412_v8 = vpop.permute.xlu0 %1411 }
 0x631   : > { %v1298_v9 = vpop.permute.xlu1 %1297 }
 0x632   : > { %2173 = vmatmul.msk.bf16.vlgmr.msrb.gmra.mxu2 %vm464_vm0, %v1298_v9 }
 0x638   : > { %v1540_v10 = vpop.permute.xlu0 %1539 }
 0x639   : > { %v1545_v13 = vsel %vm464_vm0, %v1540_v10, 0  ;;  %v1358_v14 = vpop.permute.xlu1 %1357 }
 0x63a   : > { %v1363_v16 = vsel %vm464_vm0, %v1358_v14, 0  ;;  %1554 = vmatpush.bf16.xpose.msrb.mxu2 %v1545_v13 }
 0x63b   : > { %1372 = vmatpush.bf16.xpose.msra.mxu0 %v1363_v16 }
 0x63c   : > { %v1261_v19 = vpop.f32.mrf.mxu0 }
 0x63d   : > { %v1265_v20 = vsel %vm548_vm1, %v1261_v19, -inf }
 0x63e   : > { %1266 = vmax.xlane.f32.xlu1 %v1265_v20 }
 0x640   : > { %v1653_v21 = vpop.permute.xlu0 %1652 }
 0x641   : > { %v1658_v23 = vsel %vm464_vm0, %v1653_v21, 0  ;;  %v1537_v24 = vpop.permute.xlu1 %1536 }
 0x642   : > { %2175 = vmatmul.msk.bf16.vlgmr.msra.gmra.mxu0 %vm464_vm0, %v1356_v22  ;;  %2177 = vmatmul.msk.bf16.vlgmr.msra.gmra.mxu2 %vm464_vm0, %v1412_v8 }
 0x643   : > { %1498 = vmatpush.bf16.xpose.msrb.mxu0 %v1489_v18  ;;  %1667 = vmatpush.bf16.xpose.msra.mxu2 %v1658_v23 }
 0x644   : > { %v1263_v26 = vpop.f32.mrf.mxu0 }
 0x648   : > { %v1595_v34 = vpop.permute.xlu0 %1594 }
 0x649   : > { %v1597_v29 = vpop.permute.xlu1 %1596 }
 0x64a   : > { %v1602_v31 = vsel %vm464_vm0, %v1597_v29, 0 }
 0x64b   : > { %1611 = vmatpush.bf16.xpose.msra.mxu0 %v1602_v31 }
 0x652   : > { %2179 = vmatmul.msk.bf16.vlgmr.msrb.gmra.mxu0 %vm464_vm0, %v1482_v4  ;;  %2181 = vmatmul.msk.bf16.vlgmr.msrb.gmra.mxu2 %vm464_vm0, %v1537_v24 }
 0x662   : > { %2183 = vmatmul.msk.bf16.vlgmr.msra.gmra.mxu0 %vm464_vm0, %v1595_v34  ;;  %2185 = vmatmul.msk.bf16.vlgmr.msra.gmra.mxu2 %vm464_vm0, %v1651_v33 }
 0x6b1   : > { %v1267_v36 = vpop.xlane.xlu1 %1266 }
 0x6b2   : > { %v1268_v39 = vsub.f32 %v1261_v19, %v1267_v36 }
 0x6b4   : > { %v1269_v41 = vmul.f32 1.442695, %v1268_v39 }
 0x6b5   : > { %v1317_v37 = vpop.f32.mrf.mxu2 }
 0x6b6   : > { %v1321_v38 = vsel %vm548_vm1, %v1317_v37, -inf  ;;  %2410 = vpow2.f32 %v1269_v41 }
 0x6b7   : > { %1322 = vmax.xlane.f32.xlu2 %v1321_v38 }
 0x6bc   : > { %v2411_v45 = vpop.eup %2410 }
 0x6bd   : > { %v1319_v42 = vpop.f32.mrf.mxu2  ;;  %v1271_v11 = vsel %vm548_vm1, %v2411_v45, 0.0 }
 0x6bf   : > { %v1374_v43 = vpop.f32.mrf.mxu0 }
 0x6c0   : > { %v1378_v44 = vsel %vm548_vm1, %v1374_v43, -inf }
 0x6c1   : > { %1379 = vmax.xlane.f32.xlu2 %v1378_v44 }
 0x6c5   : > { %v1430_v46 = vpop.f32.mrf.mxu2 }
 0x6c6   : > { %v1434_v55 = vsel %vm548_vm1, %v1430_v46, -inf }
 0x6c7   : > { %v1376_v40 = vpop.f32.mrf.mxu0 }
 0x6c9   : > { %1272 = vadd.xlane.f32.xlu2 %v1271_v11 }
 0x6cd   : > { %v1432_v50 = vpop.f32.mrf.mxu2 }
 0x6cf   : > { %v1500_v49 = vpop.f32.mrf.mxu0 }
 0x6d0   : > { %v1504_v51 = vsel %vm548_vm1, %v1500_v49, -inf }
 0x6d1   : > { %1505 = vmax.xlane.f32.xlu0 %v1504_v51 }
 0x6d5   : > { %v1556_v52 = vpop.f32.mrf.mxu2 }
 0x6d6   : > { %v1560_v53 = vsel %vm548_vm1, %v1556_v52, -inf }
 0x6d7   : > { %1561 = vmax.xlane.f32.xlu1 %v1560_v53  ;;  %v1502_v54 = vpop.f32.mrf.mxu0 }
 0x6d9   : > { %1435 = vmax.xlane.f32.xlu0 %v1434_v55 }
 0x6dd   : > { %v1558_v12 = vpop.f32.mrf.mxu2 }
 0x6df   : > { %v1613_v56 = vpop.f32.mrf.mxu0 }
 0x6e0   : > { %v1617_v57 = vsel %vm548_vm1, %v1613_v56, -inf }
 0x6e1   : > { %1618 = vmax.xlane.f32.xlu0 %v1617_v57 }
 0x6e5   : > { %v1669_v58 = vpop.f32.mrf.mxu2 }
 0x6e6   : > { %v1673_v59 = vsel %vm548_vm1, %v1669_v58, -inf }
 0x6e7   : > { %1674 = vmax.xlane.f32.xlu2 %v1673_v59  ;;  %v1615_v15 = vpop.f32.mrf.mxu0 }
 0x6ed   : > { %v1671_v61 = vpop.f32.mrf.mxu2 }
 0x6f5   : > { %1446 = vrot.lane.b32.xlu0 %v3059_v30, %s2621_s26 }
 0x72a   : > { %v1323_v63 = vpop.xlane.xlu2 %1322 }
 0x72b   : > { %v1324_v17 = vsub.f32 %v1317_v37, %v1323_v63 }
 0x72d   : > { %v1325_v0 = vmul.f32 1.442695, %v1324_v17 }
 0x72f   : > { %2412 = vpow2.f32 %v1325_v0 }
 0x734   : > { %v1380_v1 = vpop.xlane.xlu2 %1379 }
 0x735   : > { %v3080_v2 = vpop.eup %2412  ;;  %v1381_v4 = vsub.f32 %v1374_v43, %v1380_v1 }
 0x736   : > { %v1327_v5 = vsel %vm548_vm1, %v3080_v2, 0.0 }
 0x737   : > { %v1382_v6 = vmul.f32 1.442695, %v1381_v4  ;;  %1328 = vadd.xlane.f32.xlu1 %v1327_v5 }
 0x739   : > { %2414 = vpow2.f32 %v1382_v6 }
 0x73c   : > { %v1273_v60 = vpop.xlane.xlu2 %1272 }
 0x73d   : > { %2416 = vrcp.f32 %v1273_v60 }
 0x73f   : > { %v2415_v7 = vpop.eup %2414 }
 0x740   : > { %v1384_v8 = vsel %vm548_vm1, %v2415_v7, 0.0 }
 0x741   : > { %1385 = vadd.xlane.f32.xlu2 %v1384_v8 }
 0x743   : > { %v2417_v9 = vpop.eup %2416 }
 0x744   : > { %v1275_v10 = vmul.f32 %v2417_v9, %v2411_v45  ;;  %v1506_v13 = vpop.xlane.xlu0 %1505 }
 0x745   : > { %v1507_v14 = vsub.f32 %v1500_v49, %v1506_v13 }
 0x746   : > { %v1276_v16 = vpack.c.bf16 %v1275_v10, %v1275_v10 }
 0x747   : > { %v1508_v18 = vmul.f32 1.442695, %v1507_v14 }
 0x748   : > { %2172 = vmatmul.msk.bf16.vlgmr.msra.gmra.mxu1 %vm548_vm1, %v1276_v16 }
 0x749   : > { %2418 = vpow2.f32 %v1508_v18 }
 0x74a   : > { %v1562_v29 = vpop.xlane.xlu1 %1561 }
 0x74b   : > { %v1563_v31 = vsub.f32 %v1556_v52, %v1562_v29  ;;  %v1520_v52 = vsel %vm564_vm2, %v1484_v28, 0 }
 0x74c   : > { %v1436_v19 = vpop.xlane.xlu0 %1435 }
 0x74d   : > { %v1437_v20 = vsub.f32 %v1430_v46, %v1436_v19  ;;  %v1564_v32 = vmul.f32 1.442695, %v1563_v31 }
 0x74f   : > { %v3086_v21 = vpop.eup %2418  ;;  %v1438_v22 = vmul.f32 1.442695, %v1437_v20 }
 0x750   : > { %1334 = vrot.lane.b32.xlu1 %v3059_v30, %s2620_s5  ;;  %v1510_v23 = vsel %vm548_vm1, %v3086_v21, 0.0 }
 0x751   : > { %2420 = vpow2.f32 %v1438_v22  ;;  %1511 = vadd.xlane.f32.xlu0 %v1510_v23 }
 0x752   : > { %2422 = vpow2.f32 %v1564_v32 }
 0x754   : > { %v1619_v33 = vpop.xlane.xlu0 %1618 }
 0x755   : > { %v1620_v34 = vsub.f32 %v1613_v56, %v1619_v33 }
 0x757   : > { %v3092_v24 = vpop.eup %2420  ;;  %v1621_v36 = vmul.f32 1.442695, %v1620_v34 }
 0x758   : > { %v1440_v26 = vsel %vm548_vm1, %v3092_v24, 0.0  ;;  %v2423_v38 = vpop.eup %2422 }
 0x759   : > { %1390 = vrot.lane.b32.xlu2 %v3059_v30, %s2619_s24  ;;  %1441 = vadd.xlane.f32.xlu0 %v1440_v26  ;;  %2424 = vpow2.f32 %v1621_v36  ;;  %v1566_v62 = vsel %vm548_vm1, %v2423_v38, 0.0 }
 0x75a   : > { %v1675_v37 = vpop.xlane.xlu2 %1674 }
 0x75b   : > { %v1676_v30 = vsub.f32 %v1669_v58, %v1675_v37 }
 0x75d   : > { %v1677_v25 = vmul.f32 1.442695, %v1676_v30 }
 0x75f   : > { %v3104_v35 = vpop.eup %2424  ;;  %2426 = vpow2.f32 %v1677_v25 }
 0x760   : > { %v1623_v39 = vsel %vm548_vm1, %v3104_v35, 0.0 }
 0x761   : > { %1573 = vrot.lane.b32.xlu2 %v1484_v28, %s2620_s5 }
 0x765   : > { %v2427_v41 = vpop.eup %2426 }
 0x766   : > { %v1679_v42 = vsel %vm548_vm1, %v2427_v41, 0.0 }
 0x767   : > { %v1447_v46 = vpop.permute.xlu0 %1446 }
 0x768   : > { %v1452_v12 = vsel %vm564_vm2, %v1447_v46, 0  ;;  %v2257_v46 = vld [vmem:[%s3242_s6 + $0x18] sm:$0xff] }
 0x76d   : > { %1685 = vrot.lane.b32.xlu0 %v1484_v28, %s2621_s26 }
 0x77a   : > { %1567 = vadd.xlane.f32.xlu1 %v1566_v62 }
 0x782   : > { %1624 = vadd.xlane.f32.xlu1 %v1623_v39 }
 0x78a   : > { %1680 = vadd.xlane.f32.xlu2 %v1679_v42  ;;  %v2261_v42 = vld [vmem:[%s3242_s6 + $0x38] sm:$0xff] }
 0x78b   : > { %1771 = vmatpush.bf16.msrb.mxu0 %v2261_v42 }
 0x79b   : > { %1629 = vrot.lane.b32.xlu1 %v1484_v28, %s2619_s24 }
 0x7aa   : > { %v1329_v44 = vpop.xlane.xlu1 %1328 }
 0x7b4   : > { %v1386_v43 = vpop.xlane.xlu2 %1385 }
 0x7b5   : > { %2428 = vrcp.f32 %v1386_v43  ;;  %v2260_v43 = vld [vmem:[%s3242_s6 + $0x30] sm:$0xff] }
 0x7b6   : > { %2430 = vrcp.f32 %v1329_v44  ;;  %1772 = vmatpush.bf16.msrb.mxu0 %v2260_v43  ;;  %v2259_v44 = vld [vmem:[%s3242_s6 + $0x28] sm:$0xff] }
 0x7ba   : > { %1773 = vmatpush.bf16.msrb.mxu0 %v2259_v44 }
 0x7bb   : > { %v2429_v45 = vpop.eup %2428 }
 0x7bc   : > { %v1388_v40 = vmul.f32 %v2429_v45, %v2415_v7  ;;  %v1391_v11 = vpop.permute.xlu2 %1390  ;;  %v2431_v49 = vpop.eup %2430  ;;  %v2258_v45 = vld [vmem:[%s3242_s6 + $0x20] sm:$0xff] }
 0x7bd   : > { %v1396_v50 = vsel %vm564_vm2, %v1391_v11, 0  ;;  %v1331_v53 = vmul.f32 %v2431_v49, %v3080_v2  ;;  %v2255_v11 = vld [vmem:[%s3242_s6 + $0x8] sm:$0xff] }
 0x7be   : > { %v1389_v51 = vpack.c.bf16 %v1388_v40, %v1388_v40  ;;  %1405 = vmatpush.bf16.msrb.mxu1 %v1396_v50  ;;  %1774 = vmatpush.bf16.msrb.mxu0 %v2258_v45  ;;  %v2256_v40 = vld [vmem:[%s3242_s6 + $0x10] sm:$0xff]  ;;  %v2254_v50 = vld [vmem:[%s3242_s6] sm:$0xff] }
 0x7bf   : > { %v1332_v58 = vpack.c.bf16 %v1331_v53, %v1331_v53 }
 0x7c1   : > { %2176 = vmatmul.msk.bf16.vlgmr.msrb.gmra.mxu1 %vm548_vm1, %v1389_v51 }
 0x7c2   : > { %1529 = vmatpush.bf16.msra.mxu1 %v1520_v52  ;;  %v1335_v54 = vpop.permute.xlu1 %1334  ;;  %1775 = vmatpush.bf16.msrb.mxu0 %v2257_v46 }
 0x7c3   : > { %v1340_v55 = vsel %vm564_vm2, %v1335_v54, 0 }
 0x7c4   : > { %1349 = vmatpush.bf16.msrb.mxu3 %v1340_v55  ;;  %v1574_v56 = vpop.permute.xlu2 %1573  ;;  %v1512_v57 = vpop.xlane.xlu0 %1511 }
 0x7c5   : > { %2432 = vrcp.f32 %v1512_v57  ;;  %v3116_v59 = vpop.f32.mrf.mxu1  ;;  %v1579_v15 = vsel %vm564_vm2, %v1574_v56, 0 }
 0x7c6   : > { %1776 = vmatpush.bf16.msrb.mxu0 %v2256_v40 }
 0x7c7   : > { %2174 = vmatmul.msk.bf16.vlgmr.msrb.gmra.mxu3 %vm548_vm1, %v1332_v58 }
 0x7c8   : > { %1461 = vmatpush.bf16.msra.mxu3 %v1452_v12 }
 0x7ca   : > { %1777 = vmatpush.bf16.msrb.mxu0 %v2255_v11 }
 0x7cb   : > { %v2433_v61 = vpop.eup %2432 }
 0x7cc   : > { %1588 = vmatpush.bf16.msrb.mxu3 %v1579_v15  ;;  %v1514_v63 = vmul.f32 %v2433_v61, %v3086_v21  ;;  %v1442_v17 = vpop.xlane.xlu0 %1441 }
 0x7cd   : > { %2434 = vrcp.f32 %v1442_v17  ;;  %v1294_v0 = vpop.f32.mrf.mxu1 }
 0x7ce   : > { %v1515_v1 = vpack.c.bf16 %v1514_v63, %v1514_v63  ;;  %1778 = vmatpush.bf16.msrb.mxu0 %v2254_v50 }
 0x7d1   : > { %2180 = vmatmul.msk.bf16.vlgmr.msra.gmra.mxu1 %vm548_vm1, %v1515_v1 }
 0x7d3   : > { %v2435_v2 = vpop.eup %2434 }
 0x7d4   : > { %v1444_v4 = vmul.f32 %v2435_v2, %v3092_v24  ;;  %v3167_v2 = vld [vmem:[%s3244_s8] sm:$0xff] }
 0x7d5   : > { %v1835_v46 = vperm.slane %v3167_v2, 6 }
 0x7d6   : > { %v1445_v5 = vpack.c.bf16 %v1444_v4, %v1444_v4  ;;  %v1722_v4 = vperm.slane %v3167_v2, 5 }
 0x7d8   : > { %2178 = vmatmul.msk.bf16.vlgmr.msra.gmra.mxu3 %vm548_vm1, %v1445_v5 }
 0x7df   : > { %v1686_v6 = vpop.permute.xlu0 %1685 }
 0x7e0   : > { %v1691_v60 = vsel %vm564_vm2, %v1686_v6, 0 }
 0x7e1   : > { %1700 = vmatpush.bf16.msra.mxu3 %v1691_v60 }
 0x7ed   : > { %v1568_v7 = vpop.xlane.xlu1 %1567 }
 0x7ee   : > { %2436 = vrcp.f32 %v1568_v7 }
 0x7f4   : > { %v2437_v8 = vpop.eup %2436 }
 0x7f5   : > { %v1570_v9 = vmul.f32 %v2437_v8, %v2423_v38  ;;  %v1625_v14 = vpop.xlane.xlu1 %1624 }
 0x7f7   : > { %v1571_v10 = vpack.c.bf16 %v1570_v9, %v1570_v9 }
 0x7f9   : > { %2182 = vmatmul.msk.bf16.vlgmr.msrb.gmra.mxu3 %vm548_vm1, %v1571_v10 }
 0x7fd   : > { %v1681_v13 = vpop.xlane.xlu2 %1680 }
 0x7fe   : > { %2438 = vrcp.f32 %v1681_v13 }
 0x7ff   : > { %2440 = vrcp.f32 %v1625_v14 }
 0x804   : > { %v2439_v16 = vpop.eup %2438 }
 0x805   : > { %v1683_v18 = vmul.f32 %v2439_v16, %v2427_v41  ;;  %v2441_v20 = vpop.eup %2440 }
 0x806   : > { %v1627_v21 = vmul.f32 %v2441_v20, %v3104_v35 }
 0x807   : > { %v1684_v19 = vpack.c.bf16 %v1683_v18, %v1683_v18 }
 0x808   : > { %v1628_v24 = vpack.c.bf16 %v1627_v21, %v1627_v21  ;;  %v2263_v21 = vld [vmem:[#allocation7 + $0x8] sm:$0xff] }
 0x809   : > { %2186 = vmatmul.msk.bf16.vlgmr.msra.gmra.mxu3 %vm548_vm1, %v1684_v19 }
 0x80d   : > { %v1630_v22 = vpop.permute.xlu1 %1629 }
 0x80e   : > { %v1635_v23 = vsel %vm564_vm2, %v1630_v22, 0 }
 0x80f   : > { %1644 = vmatpush.bf16.msrb.mxu1 %v1635_v23 }
 0x812   : > { %2184 = vmatmul.msk.bf16.vlgmr.msrb.gmra.mxu1 %vm548_vm1, %v1628_v24 }
 0x813   : > { %1868 = vmatpush.bf16.msra.mxu1 %v2263_v21 }
 0x83e   : > { %v1407_v26 = vpop.f32.mrf.mxu1 }
 0x846   : > { %v1409_v27 = vpop.f32.mrf.mxu1 }
 0x84a   : > { %v1351_v28 = vpop.f32.mrf.mxu3 }
 0x84e   : > { %v1531_v29 = vpop.f32.mrf.mxu1 }
 0x852   : > { %v1353_v31 = vpop.f32.mrf.mxu3 }
 0x856   : > { %v1533_v32 = vpop.f32.mrf.mxu1 }
 0x85b   : > { %v1463_v33 = vpop.f32.mrf.mxu3 }
 0x863   : > { %v1465_v34 = vpop.f32.mrf.mxu3 }
 0x87c   : > { %v1590_v36 = vpop.f32.mrf.mxu3 }
 0x87d   : > { %v2357_v37 = vpack.i.bf16 %v1590_v36, %v1351_v28 }
 0x87f   : > { %2358 = vrot.lane.b32.xlu2 %v2357_v37, %s2621_s26  ;;  %s2561_s26 = scalar_lea.hbm %s3245_s9, 32 }
 0x884   : > { %v1592_v38 = vpop.f32.mrf.mxu3 }
 0x88c   : > { %v1702_v30 = vpop.f32.mrf.mxu3 }
 0x88d   : > { %v2367_v41 = vpack.i.bf16 %v1702_v30, %v1463_v33 }
 0x88f   : > { %v1646_v62 = vpop.f32.mrf.mxu1 }
 0x890   : > { %v2362_v25 = vpack.i.bf16 %v1646_v62, %v1407_v26  ;;  %v2262_v26 = vld [vmem:[#allocation7] sm:$0xff] }
 0x891   : > { %1869 = vmatpush.bf16.msra.mxu1 %v2262_v26 }
 0x892   : > { %2363 = vrot.lane.b32.xlu0 %v2362_v25, %s2619_s24  ;;  %s2264_s24 = sshll.u32 %s2696_s13, 4  ;;  %s1947_s13 = sshll.u32 %s401_s7, 4  ;;  %s1948_s13 = int_to_ptr.vmem [resolvable:$true] %s1947_s13 }
 0x893   : > { %s1946_s20 = scalar_lea.hbm %s3245_s9, %s2264_s24 }
 0x894   : > { %v1704_v35 = vpop.f32.mrf.mxu3  ;;  %s1949_s17 = sshll.u32 %s1946_s20, 4  ;;  %s1950_s17 = int_to_ptr.hbm [resolvable:$true] %s1949_s17 }
 0x895   : > { %s2555_s21 = sshra.s32 %s1950_s17, 4  ;;  %s2556_s21 = int_to_ptr.hbm [resolvable:$true] %s2555_s21 }
 0x896   : > { %s2557_s27 = scalar_lea.hbm %s2556_s21, 16  ;;  %p2562_p9 = scmp.lt.s32.totalorder %s2556_s21, %s3245_s9 }
 0x897   : > { %v1648_v39 = vpop.f32.mrf.mxu1  ;;  %p2558_p1 = scmp.ne.s32.totalorder %s2556_s21, %s2557_s27  ;;  %p2563_p2 = scmp.lt.s32.totalorder %s2561_s26, %s2557_s27 }
 0x899   : > { %p2559_p4 = pnand %p2558_p1, %p2747_p5  ;;  %p2564_p10 = por %p2563_p2, %p2562_p9 }
 0x89a   : > { %2368 = vrot.lane.b32.xlu0 %v2367_v41, %s2620_s5 }
 0x89b   : > { %p2560_p11 = pneg %p2559_p4 }
 0x89d   : > { %p2565_p12 = pnand %p2564_p10, %p2560_p11 }
 0x8d9   : > { %v2359_v51 = vpop.permute.xlu2 %2358 }
 0x8da   : > { %v2361_v52 = vunpack.i.h.bf16 %v2359_v51  ;;  %v2360_v53 = vunpack.i.l.bf16 %v2359_v51 }
 0x8dc   : > { %v1718_v56 = vsel %vm464_vm0, %v1531_v29, %v2361_v52  ;;  %v1479_v57 = vsel %vm464_vm0, %v3116_v59, %v2360_v53  ;;  %v1838_v53 = vperm.slane %v3167_v2, 7 }
 0x904   : > { %v2364_v49 = vpop.permute.xlu0 %2363 }
 0x905   : > { %v2366_v54 = vunpack.i.h.bf16 %v2364_v49  ;;  %v2365_v55 = vunpack.i.l.bf16 %v2364_v49 }
 0x907   : > { %v1719_v61 = vsel %vm765_vm3, %v1718_v56, %v2366_v54  ;;  %v1480_v63 = vsel %vm765_vm3, %v1479_v57, %v2365_v55  ;;  %v3186_v57 = vld [vmem:[%s3244_s8 + $0x18] sm:$0x7] }
 0x90c   : > { %v2369_v12 = vpop.permute.xlu0 %2368 }
 0x90d   : > { %v2371_v58 = vunpack.i.h.bf16 %v2369_v12  ;;  %v2370_v15 = vunpack.i.l.bf16 %v2369_v12 }
 0x90f   : > { %v1481_v17 = vsel %vm767_vm4, %v1480_v63, %v2370_v15  ;;  %v1720_v0 = vsel %vm767_vm4, %v1719_v61, %v2371_v58  ;;  %v1846_v58 = vperm.slane %v3186_v57, 0 }
 0x910   : > { %v1721_v1 = vpack.c.bf16 %v1720_v0, %v1481_v17 }
 0x912   : > { %1779 = vmatmul.bf16.vlgmr.msrb.gmra.mxu0 %v1721_v1 }
 0x98f   : > { %v1780_v59 = vpop.f32.mrf.mxu0 }
 0x990   : > { %v1781_v5 = vadd.f32 %v1780_v59, %v1722_v4 }
 0x992   : > { %v1785_v6 = vadd.f32 %v1781_v5, %v3021_v47 }
 0x994   : > { %v1787_v60 = vsel %vm464_vm0, %v1785_v6, 0.0  ;;  %v1795_v7 = vmul.f32 %v1785_v6, %v1785_v6 }
 0x995   : > { %1788 = vadd.xlane.f32.xlu1 %v1787_v60 }
 0x996   : > { %v1797_v8 = vsel %vm464_vm0, %v1795_v7, 0.0 }
 0x997   : > { %v1782_v9 = vpop.f32.mrf.mxu0  ;;  %1798 = vadd.xlane.f32.xlu0 %v1797_v8 }
 0x998   : > { %v1783_v10 = vadd.f32 %v1782_v9, %v1722_v4 }
 0x99a   : > { %v1786_v13 = vadd.f32 %v1783_v10, %v3023_v48 }
 0x99c   : > { %v1790_v14 = vsel %vm464_vm0, %v1786_v13, 0.0  ;;  %v1796_v16 = vmul.f32 %v1786_v13, %v1786_v13 }
 0x99d   : > { %1791 = vadd.xlane.f32.xlu2 %v1790_v14 }
 0x99e   : > { %v1800_v18 = vsel %vm464_vm0, %v1796_v16, 0.0 }
 0x99f   : > { %1801 = vadd.xlane.f32.xlu1 %v1800_v18 }
 0xa08   : > { %v1789_v19 = vpop.xlane.xlu1 %1788 }
 0xa09   : > { %v1793_v47 = vmul.f32 %v1789_v19, %v3005_v3 }
 0xa0a   : > { %v1799_v20 = vpop.xlane.xlu0 %1798 }
 0xa0b   : > { %v1805_v22 = vmul.f32 %v1793_v47, %v1793_v47  ;;  %v1803_v23 = vmul.f32 %v1799_v20, %v3005_v3  ;;  %v1809_v44 = vsub.f32 %v1785_v6, %v1793_v47 }
 0xa0d   : > { %v1807_v24 = vsub.f32 %v1803_v23, %v1805_v22 }
 0xa0f   : > { %v1811_v27 = vadd.f32 1e-05, %v1807_v24 }
 0xa10   : > { %v1792_v48 = vpop.xlane.xlu2 %1791 }
 0xa11   : > { %2442 = vrsqrt.f32 %v1811_v27  ;;  %v1794_v28 = vmul.f32 %v1792_v48, %v3005_v3  ;;  %vm1819_vm13 = vweird.f32 %v1811_v27 }
 0xa12   : > { %v1802_v29 = vpop.xlane.xlu1 %1801 }
 0xa13   : > { %v1806_v31 = vmul.f32 %v1794_v28, %v1794_v28  ;;  %v1804_v32 = vmul.f32 %v1802_v29, %v3005_v3  ;;  %v1810_v50 = vsub.f32 %v1786_v13, %v1794_v28 }
 0xa15   : > { %v1808_v33 = vsub.f32 %v1804_v32, %v1806_v31 }
 0xa17   : > { %v2443_v34 = vpop.eup %2442  ;;  %v1812_v36 = vadd.f32 1e-05, %v1808_v33  ;;  %v1926_v33 = vperm.slane %v3186_v57, 1 }
 0xa18   : > { %v1814_v37 = vmul.f32 %v2443_v34, %v1811_v27  ;;  %vm1820_vm12 = vweird.f32 %v2443_v34 }
 0xa19   : > { %2444 = vrsqrt.f32 %v1812_v36  ;;  %vm1821_vm14 = vmor %vm1819_vm13, %vm1820_vm12  ;;  %vm1829_vm1 = vweird.f32 %v1812_v36 }
 0xa1a   : > { %v1815_v38 = vmul.f32 %v2443_v34, %v1814_v37  ;;  %v1929_v37 = vperm.slane %v3186_v57, 2 }
 0xa1c   : > { %v1816_v30 = vmul.f32 0.5, %v1815_v38 }
 0xa1e   : > { %v1817_v62 = vsub.f32 1.5, %v1816_v30 }
 0xa1f   : > { %v2445_v25 = vpop.eup %2444 }
 0xa20   : > { %v1818_v35 = vmul.f32 %v2443_v34, %v1817_v62  ;;  %v1824_v39 = vmul.f32 %v2445_v25, %v1812_v36  ;;  %vm1830_vm15 = vweird.f32 %v2445_v25 }
 0xa21   : > { %vm1831_vm2 = vmor %vm1829_vm1, %vm1830_vm15 }
 0xa22   : > { %v1825_v41 = vmul.f32 %v2445_v25, %v1824_v39  ;;  %v1822_v42 = vsel %vm1821_vm14, %v2443_v34, %v1818_v35 }
 0xa23   : > { %v1833_v40 = vmul.f32 %v1822_v42, %v1809_v44 }
 0xa24   : > { %v1826_v43 = vmul.f32 0.5, %v1825_v41 }
 0xa25   : > { %v1836_v51 = vmul.f32 %v1835_v46, %v1833_v40 }
 0xa26   : > { %v1827_v45 = vsub.f32 1.5, %v1826_v43 }
 0xa27   : > { %v1839_v55 = vadd.f32 %v1838_v53, %v1836_v51 }
 0xa28   : > { %v1828_v11 = vmul.f32 %v2445_v25, %v1827_v45 }
 0xa2a   : > { %v1832_v49 = vsel %vm1831_vm2, %v2445_v25, %v1828_v11 }
 0xa2b   : > { %v1834_v52 = vmul.f32 %v1832_v49, %v1810_v50 }
 0xa2d   : > { %v1837_v54 = vmul.f32 %v1835_v46, %v1834_v52 }
 0xa2f   : > { %v1840_v12 = vadd.f32 %v1838_v53, %v1837_v54 }
 0xa31   : > { %v1841_v56 = vpack.c.bf16 %v1840_v12, %v1839_v55 }
 0xa33   : > { %2227 = vmatmul.msk.bf16.vlgmr.msra.gmra.mxu1 %vm464_vm0, %v1841_v56 }
 0xab0   : > { %v1871_v15 = vpop.f32.mrf.mxu1 }
 0xab1   : > { %v1872_v61 = vadd.f32 %v1871_v15, %v1846_v58 }
 0xab3   : > { %v1876_v63 = vadd.f32 %v1872_v61, %v1839_v55 }
 0xab5   : > { %v1878_v17 = vsel %vm464_vm0, %v1876_v63, 0.0  ;;  %v1886_v0 = vmul.f32 %v1876_v63, %v1876_v63 }
 0xab6   : > { %1879 = vadd.xlane.f32.xlu2 %v1878_v17 }
 0xab7   : > { %v1888_v1 = vsel %vm464_vm0, %v1886_v0, 0.0 }
 0xab8   : > { %v1873_v2 = vpop.f32.mrf.mxu1  ;;  %1889 = vadd.xlane.f32.xlu1 %v1888_v1 }
 0xab9   : > { %v1874_v4 = vadd.f32 %v1873_v2, %v1846_v58 }
 0xabb   : > { %v1877_v59 = vadd.f32 %v1874_v4, %v1840_v12 }
 0xabd   : > { %v1881_v5 = vsel %vm464_vm0, %v1877_v59, 0.0  ;;  %v1887_v6 = vmul.f32 %v1877_v59, %v1877_v59 }
 0xabe   : > { %1882 = vadd.xlane.f32.xlu0 %v1881_v5 }
 0xabf   : > { %v1891_v60 = vsel %vm464_vm0, %v1887_v6, 0.0 }
 0xac0   : > { %1892 = vadd.xlane.f32.xlu2 %v1891_v60 }
 0xb29   : > { %v1880_v7 = vpop.xlane.xlu2 %1879 }
 0xb2a   : > { %v1884_v8 = vmul.f32 %v1880_v7, %v3005_v3 }
 0xb2b   : > { %v1890_v9 = vpop.xlane.xlu1 %1889 }
 0xb2c   : > { %v1896_v10 = vmul.f32 %v1884_v8, %v1884_v8  ;;  %v1894_v13 = vmul.f32 %v1890_v9, %v3005_v3  ;;  %v1900_v34 = vsub.f32 %v1876_v63, %v1884_v8 }
 0xb2e   : > { %v1898_v14 = vsub.f32 %v1894_v13, %v1896_v10 }
 0xb30   : > { %v1902_v16 = vadd.f32 1e-05, %v1898_v14 }
 0xb31   : > { %v1883_v18 = vpop.xlane.xlu0 %1882 }
 0xb32   : > { %2446 = vrsqrt.f32 %v1902_v16  ;;  %v1885_v19 = vmul.f32 %v1883_v18, %v3005_v3  ;;  %vm1910_vm4 = vweird.f32 %v1902_v16 }
 0xb33   : > { %v1893_v47 = vpop.xlane.xlu2 %1892 }
 0xb34   : > { %v1897_v20 = vmul.f32 %v1885_v19, %v1885_v19  ;;  %v1895_v21 = vmul.f32 %v1893_v47, %v3005_v3  ;;  %v1901_v41 = vsub.f32 %v1877_v59, %v1885_v19 }
 0xb36   : > { %v1899_v22 = vsub.f32 %v1895_v21, %v1897_v20 }
 0xb38   : > { %v2447_v23 = vpop.eup %2446  ;;  %v1903_v24 = vadd.f32 1e-05, %v1899_v22 }
 0xb39   : > { %v1905_v26 = vmul.f32 %v2447_v23, %v1902_v16  ;;  %vm1911_vm3 = vweird.f32 %v2447_v23 }
 0xb3a   : > { %2448 = vrsqrt.f32 %v1903_v24  ;;  %vm1912_vm5 = vmor %vm1910_vm4, %vm1911_vm3  ;;  %vm1920_vm7 = vweird.f32 %v1903_v24 }
 0xb3b   : > { %v1906_v27 = vmul.f32 %v2447_v23, %v1905_v26 }
 0xb3d   : > { %v1907_v48 = vmul.f32 0.5, %v1906_v27 }
 0xb3f   : > { %v1908_v28 = vsub.f32 1.5, %v1907_v48 }
 0xb40   : > { %v2449_v29 = vpop.eup %2448 }
 0xb41   : > { %v1909_v31 = vmul.f32 %v2447_v23, %v1908_v28  ;;  %v1915_v32 = vmul.f32 %v2449_v29, %v1903_v24  ;;  %vm1921_vm6 = vweird.f32 %v2449_v29 }
 0xb42   : > { %vm1922_vm8 = vmor %vm1920_vm7, %vm1921_vm6 }
 0xb43   : > { %v1913_v3 = vsel %vm1912_vm5, %v2447_v23, %v1909_v31  ;;  %v1916_v36 = vmul.f32 %v2449_v29, %v1915_v32 }
 0xb44   : > { %v1924_v38 = vmul.f32 %v1913_v3, %v1900_v34 }
 0xb45   : > { %v1917_v30 = vmul.f32 0.5, %v1916_v36 }
 0xb46   : > { %v1927_v62 = vmul.f32 %v1926_v33, %v1924_v38 }
 0xb47   : > { %v1918_v25 = vsub.f32 1.5, %v1917_v30 }
 0xb48   : > { %v1930_v35 = vadd.f32 %v1929_v37, %v1927_v62 }
 0xb49   : > { %v1919_v39 = vmul.f32 %v2449_v29, %v1918_v25 }
 0xb4a   : > { %1932 = vst.msk [vmem:[%s401_s7] sm:$0xff] %vm464_vm0, %v1930_v35 }
 0xb4b   : > { %v1923_v42 = vsel %vm1922_vm8, %v2449_v29, %v1919_v39 }
 0xb4c   : > { %v1925_v43 = vmul.f32 %v1923_v42, %v1901_v41 }
 0xb4e   : > { %v1928_v44 = vmul.f32 %v1926_v33, %v1925_v43 }
 0xb50   : > { %v1931_v45 = vadd.f32 %v1929_v37, %v1928_v44 }
 0xb52   : > { %1933 = vst.msk [vmem:[%s401_s7 + $0x8] sm:$0xff] %vm464_vm0, %v1931_v45 }
 0xb53   : > { %2568 = shalt.err (!%p2565_p12)
}
 0xb54   : > { %s2623_s25 = smov 128   ;;  %s2624_s14 = smov 8  }
 0xb55   : > { %2275 = dma.vmem_to_hbm [thread:$0]  (%p2747_p5), %s1948_s13, 256, %s1950_s17, %s1935_s22, %s2623_s25, %s2623_s25, %s2624_s14  }
 0xb56 PF: > { %s1964_s5 = sand.u32 1, %s2599_s30   ;;  %p3262_p13 = scmp.ge.s32.totalorder %s2611_s12, 2 }
 0xb57   : > { %s1965_s20 = scalar_lea.sflag [#allocation4], %s1964_s5 }
 0xb58   : > { %p2289_p0 = pnand %p3262_p13, %p2710_p6 }
 0xb5a   : > { %p2290_p3 = pneg %p2289_p0 }
 0xb5c   : > { %2594 = dma.done.wait (%p2290_p3), %s1965_s20, 256  }
 0xb5d   : > { %2596 = vsyncadd (%p2290_p3), %s1965_s20, 4294967040  ;;  %s3263_s28 = sld [smem:[#allocation12_spill]]  ;;  %p23_p7 = scmp.ge.s32.totalorder %s2734_s18, 4  }
 0xb5e   : > { %s3264_s30 = smov %s2603_s10  ;;  %s3265_s10 = smov %s2607_s11 }
 0xb5f   : > { %s3267_s12 = smov %s2734_s18  ;;  %25 = sbr.rel (!%p23_p7) target bundleno = 9 (0x9), region = 112 }
 0xb63   : > { %s3266_s11 = smov %s3263_s28 }
 0xb64   :  { %1971 = vsyncpa [#allocation3], 1 }
 0xb65   :  { %1973 = vsyncpa [#allocation3 + $0x1], 1 }
 0xb66   :  { %1974 = vsyncpa [#allocation6], 1 }
 0xb67   :  { %1975 = vsyncpa [#allocation4], 1 }
 0xb68   :  { %1977 = vsyncpa [#allocation4 + $0x1], 1 }

</bundles_post_ra>
